<compile_context>
chip_gen: v7x
topology: tpu7x:2x2x1
jax: 0.10.0
libtpu: 0.0.40
codegen_flags: <defaults>
</compile_context>

<pallas_src>
import functools
from math import sqrt

import jax
import jax.numpy as jnp
from jax import lax
from jax.experimental import pallas as pl
from jax.experimental.pallas import tpu as pltpu

# ---- model hyperparameters (small, consistent with the module) ----
B = 2            # batch
T = 8            # decoder sequence length
S = 8            # encoder sequence length
EMBED_DIM = 32   # embed_dim
D_MODEL = 32     # d_model
NUM_HEADS = 4
HEAD_DIM = D_MODEL // NUM_HEADS
FFWD_DIM = 64
MAX_SEQ_LEN = 16
LN_EPS = 1e-5

# ---- packed-parameter layout -------------------------------------------------
# Weight slab (bf16, (64, 896)): every matrix starts at a 128-lane boundary so
# in-kernel slices are zero-cost aligned views.
_W_QKV_S = 0 * 128   # (32, 96)  fused self-attn q|k|v (q pre-scaled by 1/sqrt(hd))
_W_O_S   = 1 * 128   # (32, 32)  self-attn output projection
_W_Q_C   = 2 * 128   # (32, 32)  cross-attn q (pre-scaled)
_W_KV_C  = 3 * 128   # (32, 64)  fused cross-attn k|v
_W_O_C   = 4 * 128   # (32, 32)  cross-attn output projection
_W_1     = 5 * 128   # (32, 64)  ffwd hidden
_W_2     = 6 * 128   # (64, 32)  ffwd output
SLAB_SHAPE = (64, 7 * 128)

# Scalar-parameter matrix (f32, (16, 128)): one bias / LayerNorm vector per
# sublane row, all starting at lane 0 (row slices are cheap; no lane rotates).
_R_B_QKV_S, _R_B_O_S, _R_B_Q_C, _R_B_KV_C, _R_B_O_C, _R_B_1, _R_B_2 = range(7)
_R_G1, _R_BE1, _R_G2, _R_BE2, _R_G3, _R_BE3 = range(8, 14)
PMAT_SHAPE = (16, 128)


def _layernorm(y, g, b):
    mu = jnp.mean(y, axis=-1, keepdims=True)
    var = jnp.mean(jnp.square(y - mu), axis=-1, keepdims=True)
    return (y - mu) * lax.rsqrt(var + LN_EPS) * g + b


def _mha(q2d, k2d, v2d, batch, tq, tk, wo, bo, mask_bias):
    """Multi-head attention, vectorized over heads.

    Heads are folded into the leading (batch) axis so there is ONE batched
    score einsum, ONE additive mask, ONE softmax and ONE PV einsum for all
    heads, then a single full-width output projection.
    q2d: (batch*tq, D_MODEL) f32; k2d/v2d: (batch*tk, D_MODEL) f32.
    The 1/sqrt(head_dim) score scale is pre-folded into the Q projection.
    Returns (batch*tq, EMBED_DIM) f32.
    """
    q3 = q2d.reshape(batch, tq, D_MODEL)
    k3 = k2d.reshape(batch, tk, D_MODEL)
    v3 = v2d.reshape(batch, tk, D_MODEL)

    def fold_heads(a3):  # (batch, t, D) -> (H*batch, t, hd); leading order (h, b)
        return jnp.concatenate(
            [a3[:, :, h * HEAD_DIM:(h + 1) * HEAD_DIM] for h in range(NUM_HEADS)],
            axis=0)

    qh = fold_heads(q3)
    kh = fold_heads(k3)
    vh = fold_heads(v3)

    s = jnp.einsum('bqd,bkd->bqk',
                   qh.astype(jnp.bfloat16), kh.astype(jnp.bfloat16),
                   preferred_element_type=jnp.float32)        # (H*batch, tq, tk)
    if mask_bias is not None:
        s = s + mask_bias                                     # one additive mask
    s = s - jnp.max(s, axis=-1, keepdims=True)                # one softmax, all heads
    p = jnp.exp(s)
    p = p * pl.reciprocal(jnp.sum(p, axis=-1, keepdims=True), approx=True)

    o = jnp.einsum('bqk,bkd->bqd',
                   p.astype(jnp.bfloat16), vh.astype(jnp.bfloat16),
                   preferred_element_type=jnp.float32)        # (H*batch, tq, hd)

    # un-fold heads back onto the lane axis, then ONE (K=D_MODEL) output proj
    o_cat = jnp.concatenate(
        [o[h * batch:(h + 1) * batch] for h in range(NUM_HEADS)], axis=-1)
    o2d = o_cat.reshape(batch * tq, D_MODEL)
    return jnp.dot(o2d.astype(jnp.bfloat16), wo,
                   preferred_element_type=jnp.float32) + bo


def decoder_layer_kernel(x_ref, enc_ref, w_ref, p_ref, out_ref, *,
                         batch, t_dec, t_enc):
    x = x_ref[...]       # (batch*t_dec, E) f32
    enc = enc_ref[...]   # (batch*t_enc, E) f32

    # ---- zero-cost parameter views (all 128-lane / sublane aligned) ----
    w_qkv_s = w_ref[0:EMBED_DIM, _W_QKV_S:_W_QKV_S + 3 * D_MODEL]
    w_o_s = w_ref[0:D_MODEL, _W_O_S:_W_O_S + EMBED_DIM]
    w_q_c = w_ref[0:EMBED_DIM, _W_Q_C:_W_Q_C + D_MODEL]
    w_kv_c = w_ref[0:EMBED_DIM, _W_KV_C:_W_KV_C + 2 * D_MODEL]
    w_o_c = w_ref[0:D_MODEL, _W_O_C:_W_O_C + EMBED_DIM]
    w_1 = w_ref[0:EMBED_DIM, _W_1:_W_1 + FFWD_DIM]
    w_2 = w_ref[0:FFWD_DIM, _W_2:_W_2 + EMBED_DIM]

    def row(r, n):  # biases / LN params: sublane row slice starting at lane 0
        return p_ref[r:r + 1, 0:n]

    b_qkv_s = row(_R_B_QKV_S, 3 * D_MODEL)
    b_o_s = row(_R_B_O_S, EMBED_DIM)
    b_q_c = row(_R_B_Q_C, D_MODEL)
    b_kv_c = row(_R_B_KV_C, 2 * D_MODEL)
    b_o_c = row(_R_B_O_C, EMBED_DIM)
    b_1 = row(_R_B_1, FFWD_DIM)
    b_2 = row(_R_B_2, EMBED_DIM)
    g1, be1 = row(_R_G1, EMBED_DIM), row(_R_BE1, EMBED_DIM)
    g2, be2 = row(_R_G2, EMBED_DIM), row(_R_BE2, EMBED_DIM)
    g3, be3 = row(_R_G3, EMBED_DIM), row(_R_BE3, EMBED_DIM)

    # causal mask built once, as a (T, T) additive bias shared by all heads
    rows = lax.broadcasted_iota(jnp.int32, (t_dec, t_dec), 0)
    cols = lax.broadcasted_iota(jnp.int32, (t_dec, t_dec), 1)
    causal_bias = jnp.where(cols > rows, jnp.float32(-1e30), jnp.float32(0.0))
    # TODO(synk): optional decoder_padding_mask (OR'd with the causal mask) not wired in.

    # ---- masked multi-head self-attention + residual + LayerNorm ----
    qkv = jnp.dot(x.astype(jnp.bfloat16), w_qkv_s,
                  preferred_element_type=jnp.float32) + b_qkv_s
    sa = _mha(qkv[:, 0:D_MODEL], qkv[:, D_MODEL:2 * D_MODEL], qkv[:, 2 * D_MODEL:],
              batch, t_dec, t_dec, w_o_s, b_o_s, causal_bias)
    x1 = _layernorm(x + sa, g1, be1)

    # ---- multi-head cross-attention (queries: decoder, k/v: encoder) + LN ----
    qc = jnp.dot(x1.astype(jnp.bfloat16), w_q_c,
                 preferred_element_type=jnp.float32) + b_q_c
    kv = jnp.dot(enc.astype(jnp.bfloat16), w_kv_c,
                 preferred_element_type=jnp.float32) + b_kv_c
    ca = _mha(qc, kv[:, 0:D_MODEL], kv[:, D_MODEL:],
              batch, t_dec, t_enc, w_o_c, b_o_c, None)
    x2 = _layernorm(x1 + ca, g2, be2)

    # ---- feed-forward (Linear -> ReLU -> Linear) + residual + LN ----
    h = jnp.maximum(
        jnp.dot(x2.astype(jnp.bfloat16), w_1, preferred_element_type=jnp.float32) + b_1,
        0.0)
    ff = jnp.dot(h.astype(jnp.bfloat16), w_2, preferred_element_type=jnp.float32) + b_2
    x3 = _layernorm(x2 + ff, g3, be3)

    out_ref[...] = x3   # (batch*t_dec, E); reshape to (B, T, E) is free in the wrapper


@jax.jit
def decoder_layer(x, encoder_out, params):
    """x: (B, T, E), encoder_out: (B, S, E). Returns (B, T, E)."""
    w_slab, pmat = params
    batch, t, e = x.shape
    s = encoder_out.shape[1]
    x2d = x.reshape(batch * t, e)              # leading-dim reshape: free
    enc2d = encoder_out.reshape(batch * s, e)

    kernel = functools.partial(decoder_layer_kernel, batch=batch, t_dec=t, t_enc=s)
    out2d = pl.pallas_call(
        kernel,
        out_shape=jax.ShapeDtypeStruct((batch * t, e), jnp.float32),
        # whole (tiny) operands resident in VMEM; single invocation, no grid
        in_specs=[pl.BlockSpec(memory_space=pltpu.MemorySpace.VMEM)] * 4,
        out_specs=pl.BlockSpec(memory_space=pltpu.MemorySpace.VMEM),
    )(x2d, enc2d, w_slab, pmat)
    return out2d.reshape(batch, t, e)          # free reshape back


# ------------------------------ parameters -----------------------------------
def init_raw_params(key):
    """Deterministic synthetic per-matrix weights (Linear weights stored (in, out))."""
    keys = jax.random.split(key, 20)
    k = iter(keys)

    def w(fan_in, fan_out):
        return jax.random.normal(next(k), (fan_in, fan_out), jnp.float32) * (1.0 / sqrt(fan_in))

    def bias(n):
        return 0.1 * jax.random.normal(next(k), (n,), jnp.float32)

    ones = jnp.ones((EMBED_DIM,), jnp.float32)
    zeros = jnp.zeros((EMBED_DIM,), jnp.float32)
    return dict(
        wq_s=w(EMBED_DIM, D_MODEL), bq_s=bias(D_MODEL),
        wk_s=w(EMBED_DIM, D_MODEL), bk_s=bias(D_MODEL),
        wv_s=w(EMBED_DIM, D_MODEL), bv_s=bias(D_MODEL),
        wo_s=w(D_MODEL, EMBED_DIM), bo_s=bias(EMBED_DIM),
        wq_c=w(EMBED_DIM, D_MODEL), bq_c=bias(D_MODEL),
        wk_c=w(EMBED_DIM, D_MODEL), bk_c=bias(D_MODEL),
        wv_c=w(EMBED_DIM, D_MODEL), bv_c=bias(D_MODEL),
        wo_c=w(D_MODEL, EMBED_DIM), bo_c=bias(EMBED_DIM),
        w1=w(EMBED_DIM, FFWD_DIM), b1=bias(FFWD_DIM),
        w2=w(FFWD_DIM, EMBED_DIM), b2=bias(EMBED_DIM),
        g1=ones, be1=zeros, g2=ones, be2=zeros, g3=ones, be3=zeros,
    )


def pack_params(raw):
    """Pack into 2 kernel inputs: a 128-lane-aligned bf16 weight slab and an
    (16,128) f32 bias/LayerNorm matrix. 1/sqrt(head_dim) folded into Q proj."""
    scale = 1.0 / sqrt(HEAD_DIM)

    slab = jnp.zeros(SLAB_SHAPE, jnp.float32)
    wqkv_s = jnp.concatenate([raw['wq_s'] * scale, raw['wk_s'], raw['wv_s']], axis=1)
    wkv_c = jnp.concatenate([raw['wk_c'], raw['wv_c']], axis=1)
    slab = slab.at[0:EMBED_DIM, _W_QKV_S:_W_QKV_S + 3 * D_MODEL].set(wqkv_s)
    slab = slab.at[0:D_MODEL, _W_O_S:_W_O_S + EMBED_DIM].set(raw['wo_s'])
    slab = slab.at[0:EMBED_DIM, _W_Q_C:_W_Q_C + D_MODEL].set(raw['wq_c'] * scale)
    slab = slab.at[0:EMBED_DIM, _W_KV_C:_W_KV_C + 2 * D_MODEL].set(wkv_c)
    slab = slab.at[0:D_MODEL, _W_O_C:_W_O_C + EMBED_DIM].set(raw['wo_c'])
    slab = slab.at[0:EMBED_DIM, _W_1:_W_1 + FFWD_DIM].set(raw['w1'])
    slab = slab.at[0:FFWD_DIM, _W_2:_W_2 + EMBED_DIM].set(raw['w2'])
    slab = slab.astype(jnp.bfloat16)

    pmat = jnp.zeros(PMAT_SHAPE, jnp.float32)
    bqkv_s = jnp.concatenate([raw['bq_s'] * scale, raw['bk_s'], raw['bv_s']])
    bkv_c = jnp.concatenate([raw['bk_c'], raw['bv_c']])
    pmat = pmat.at[_R_B_QKV_S, 0:3 * D_MODEL].set(bqkv_s)
    pmat = pmat.at[_R_B_O_S, 0:EMBED_DIM].set(raw['bo_s'])
    pmat = pmat.at[_R_B_Q_C, 0:D_MODEL].set(raw['bq_c'] * scale)
    pmat = pmat.at[_R_B_KV_C, 0:2 * D_MODEL].set(bkv_c)
    pmat = pmat.at[_R_B_O_C, 0:EMBED_DIM].set(raw['bo_c'])
    pmat = pmat.at[_R_B_1, 0:FFWD_DIM].set(raw['b1'])
    pmat = pmat.at[_R_B_2, 0:EMBED_DIM].set(raw['b2'])
    pmat = pmat.at[_R_G1, 0:EMBED_DIM].set(raw['g1'])
    pmat = pmat.at[_R_BE1, 0:EMBED_DIM].set(raw['be1'])
    pmat = pmat.at[_R_G2, 0:EMBED_DIM].set(raw['g2'])
    pmat = pmat.at[_R_BE2, 0:EMBED_DIM].set(raw['be2'])
    pmat = pmat.at[_R_G3, 0:EMBED_DIM].set(raw['g3'])
    pmat = pmat.at[_R_BE3, 0:EMBED_DIM].set(raw['be3'])
    return slab, pmat


# ---------------------- pure-JAX reference (f32) ------------------------------
def reference_decoder_layer(x, enc, raw):
    t_dec = x.shape[1]
    scale = 1.0 / sqrt(HEAD_DIM)

    def softmax(s):
        s = s - jnp.max(s, axis=-1, keepdims=True)
        e = jnp.exp(s)
        return e / jnp.sum(e, axis=-1, keepdims=True)

    def mha(xq, xkv, wq, bq, wk, bk, wv, bv, wo, bo, use_mask):
        outs = []
        for h in range(NUM_HEADS):
            sl = slice(h * HEAD_DIM, (h + 1) * HEAD_DIM)
            q = xq @ wq[:, sl] + bq[sl]
            k = xkv @ wk[:, sl] + bk[sl]
            v = xkv @ wv[:, sl] + bv[sl]
            s = jnp.einsum('btd,bsd->bts', q, k) * scale
            if use_mask:
                m = jnp.triu(jnp.ones((t_dec, t_dec), bool), k=1)
                s = jnp.where(m, -jnp.inf, s)
            outs.append(jnp.einsum('bts,bsd->btd', softmax(s), v))
        return jnp.concatenate(outs, axis=-1) @ wo + bo

    def ln(y, g, b):
        mu = y.mean(-1, keepdims=True)
        var = ((y - mu) ** 2).mean(-1, keepdims=True)
        return (y - mu) / jnp.sqrt(var + LN_EPS) * g + b

    sa = mha(x, x, raw['wq_s'], raw['bq_s'], raw['wk_s'], raw['bk_s'],
             raw['wv_s'], raw['bv_s'], raw['wo_s'], raw['bo_s'], True)
    x1 = ln(x + sa, raw['g1'], raw['be1'])
    ca = mha(x1, enc, raw['wq_c'], raw['bq_c'], raw['wk_c'], raw['bk_c'],
             raw['wv_c'], raw['bv_c'], raw['wo_c'], raw['bo_c'], False)
    x2 = ln(x1 + ca, raw['g2'], raw['be2'])
    hdn = jnp.maximum(x2 @ raw['w1'] + raw['b1'], 0.0)
    ff = hdn @ raw['w2'] + raw['b2']
    return ln(x2 + ff, raw['g3'], raw['be3'])


if __name__ == "__main__":
    key = jax.random.PRNGKey(0)
    kx, kenc, kp = jax.random.split(key, 3)

    x = jax.random.normal(kx, (B, T, EMBED_DIM), jnp.float32)
    encoder_out = jax.random.normal(kenc, (B, S, EMBED_DIM), jnp.float32)

    raw = init_raw_params(kp)
    params = pack_params(raw)

    out = decoder_layer(x, encoder_out, params)
    jax.block_until_ready(out)

    assert out.shape == (B, T, EMBED_DIM)
    assert bool(jnp.all(jnp.isfinite(out)))

    # loose tolerance: kernel uses bf16 MXU operands (f32 accumulation) and an
    # approximate EUP reciprocal in the softmax
    ref = reference_decoder_layer(x, encoder_out, raw)
    err = float(jnp.max(jnp.abs(out - ref)))
    assert jnp.allclose(out, ref, atol=1e-1, rtol=1e-1), f"max abs err {err}"

    print("KERNEL_OK")
</pallas_src>

<mosaic_0001>
module attributes {stable_mosaic.version = 11 : i64} {
  func.func @decoder_layer_kernel(%arg0: memref<16x32xf32, #tpu.memory_space<vmem>>, %arg1: memref<16x32xf32, #tpu.memory_space<vmem>>, %arg2: memref<64x896xbf16, #tpu.memory_space<vmem>>, %arg3: memref<16x128xf32, #tpu.memory_space<vmem>>, %arg4: memref<16x32xf32, #tpu.memory_space<vmem>>) attributes {dimension_semantics = [], scalar_prefetch = 0 : i64, scratch_operands = 0 : i64, tpu.core_type = #tpu.core_type<tc>} {
    %c0 = arith.constant 0 : index
    %c0_0 = arith.constant 0 : index
    %0 = vector.load %arg0[%c0, %c0_0] : memref<16x32xf32, #tpu.memory_space<vmem>>, vector<16x32xf32>
    %c0_1 = arith.constant 0 : index
    %c0_2 = arith.constant 0 : index
    %1 = vector.load %arg1[%c0_1, %c0_2] : memref<16x32xf32, #tpu.memory_space<vmem>>, vector<16x32xf32>
    %c0_3 = arith.constant 0 : index
    %c0_4 = arith.constant 0 : index
    %2 = vector.load %arg2[%c0_3, %c0_4] : memref<64x896xbf16, #tpu.memory_space<vmem>>, vector<32x96xbf16>
    %c0_5 = arith.constant 0 : index
    %c128 = arith.constant 128 : index
    %3 = vector.load %arg2[%c0_5, %c128] : memref<64x896xbf16, #tpu.memory_space<vmem>>, vector<32x32xbf16>
    %c0_6 = arith.constant 0 : index
    %c256 = arith.constant 256 : index
    %4 = vector.load %arg2[%c0_6, %c256] : memref<64x896xbf16, #tpu.memory_space<vmem>>, vector<32x32xbf16>
    %c0_7 = arith.constant 0 : index
    %c384 = arith.constant 384 : index
    %5 = vector.load %arg2[%c0_7, %c384] : memref<64x896xbf16, #tpu.memory_space<vmem>>, vector<32x64xbf16>
    %c0_8 = arith.constant 0 : index
    %c512 = arith.constant 512 : index
    %6 = vector.load %arg2[%c0_8, %c512] : memref<64x896xbf16, #tpu.memory_space<vmem>>, vector<32x32xbf16>
    %c0_9 = arith.constant 0 : index
    %c640 = arith.constant 640 : index
    %7 = vector.load %arg2[%c0_9, %c640] : memref<64x896xbf16, #tpu.memory_space<vmem>>, vector<32x64xbf16>
    %c0_10 = arith.constant 0 : index
    %c768 = arith.constant 768 : index
    %8 = vector.load %arg2[%c0_10, %c768] : memref<64x896xbf16, #tpu.memory_space<vmem>>, vector<64x32xbf16>
    %c0_11 = arith.constant 0 : index
    %c0_12 = arith.constant 0 : index
    %9 = vector.load %arg3[%c0_11, %c0_12] : memref<16x128xf32, #tpu.memory_space<vmem>>, vector<1x96xf32>
    %c1 = arith.constant 1 : index
    %c0_13 = arith.constant 0 : index
    %10 = vector.load %arg3[%c1, %c0_13] : memref<16x128xf32, #tpu.memory_space<vmem>>, vector<1x32xf32>
    %c2 = arith.constant 2 : index
    %c0_14 = arith.constant 0 : index
    %11 = vector.load %arg3[%c2, %c0_14] : memref<16x128xf32, #tpu.memory_space<vmem>>, vector<1x32xf32>
    %c3 = arith.constant 3 : index
    %c0_15 = arith.constant 0 : index
    %12 = vector.load %arg3[%c3, %c0_15] : memref<16x128xf32, #tpu.memory_space<vmem>>, vector<1x64xf32>
    %c4 = arith.constant 4 : index
    %c0_16 = arith.constant 0 : index
    %13 = vector.load %arg3[%c4, %c0_16] : memref<16x128xf32, #tpu.memory_space<vmem>>, vector<1x32xf32>
    %c5 = arith.constant 5 : index
    %c0_17 = arith.constant 0 : index
    %14 = vector.load %arg3[%c5, %c0_17] : memref<16x128xf32, #tpu.memory_space<vmem>>, vector<1x64xf32>
    %c6 = arith.constant 6 : index
    %c0_18 = arith.constant 0 : index
    %15 = vector.load %arg3[%c6, %c0_18] : memref<16x128xf32, #tpu.memory_space<vmem>>, vector<1x32xf32>
    %c8 = arith.constant 8 : index
    %c0_19 = arith.constant 0 : index
    %16 = vector.load %arg3[%c8, %c0_19] : memref<16x128xf32, #tpu.memory_space<vmem>>, vector<1x32xf32>
    %c9 = arith.constant 9 : index
    %c0_20 = arith.constant 0 : index
    %17 = vector.load %arg3[%c9, %c0_20] : memref<16x128xf32, #tpu.memory_space<vmem>>, vector<1x32xf32>
    %c10 = arith.constant 10 : index
    %c0_21 = arith.constant 0 : index
    %18 = vector.load %arg3[%c10, %c0_21] : memref<16x128xf32, #tpu.memory_space<vmem>>, vector<1x32xf32>
    %c11 = arith.constant 11 : index
    %c0_22 = arith.constant 0 : index
    %19 = vector.load %arg3[%c11, %c0_22] : memref<16x128xf32, #tpu.memory_space<vmem>>, vector<1x32xf32>
    %c12 = arith.constant 12 : index
    %c0_23 = arith.constant 0 : index
    %20 = vector.load %arg3[%c12, %c0_23] : memref<16x128xf32, #tpu.memory_space<vmem>>, vector<1x32xf32>
    %c13 = arith.constant 13 : index
    %c0_24 = arith.constant 0 : index
    %21 = vector.load %arg3[%c13, %c0_24] : memref<16x128xf32, #tpu.memory_space<vmem>>, vector<1x32xf32>
    %22 = tpu.iota {dimensions = array<i32: 0>} : vector<8x8xi32>
    %23 = tpu.iota {dimensions = array<i32: 1>} : vector<8x8xi32>
    %24 = arith.cmpi sgt, %23, %22 : vector<8x8xi32>
    %cst = arith.constant -1.000000e+30 : f32
    %cst_25 = arith.constant 0.000000e+00 : f32
    %25 = vector.broadcast %cst : f32 to vector<8x8xf32>
    %26 = vector.broadcast %cst_25 : f32 to vector<8x8xf32>
    %27 = arith.select %24, %25, %26 : vector<8x8xi1>, vector<8x8xf32>
    %28 = arith.truncf %0 : vector<16x32xf32> to vector<16x32xbf16>
    %cst_26 = arith.constant dense<0.000000e+00> : vector<16x96xf32>
    %29 = tpu.matmul %28, %2, %cst_26 {dimension_numbers = #tpu.dot_dimension_numbers<[1], [0], [0], [1], [0, 0, 1, 1], [], []>} : vector<16x32xbf16>, vector<32x96xbf16>, vector<16x96xf32> -> vector<16x96xf32>
    %30 = vector.broadcast %9 : vector<1x96xf32> to vector<16x96xf32>
    %31 = arith.addf %29, %30 : vector<16x96xf32>
    %32 = vector.extract_strided_slice %31 {offsets = [0, 0], sizes = [16, 32], strides = [1, 1]} : vector<16x96xf32> to vector<16x32xf32>
    %33 = vector.extract_strided_slice %31 {offsets = [0, 32], sizes = [16, 32], strides = [1, 1]} : vector<16x96xf32> to vector<16x32xf32>
    %34 = vector.extract_strided_slice %31 {offsets = [0, 64], sizes = [16, 32], strides = [1, 1]} : vector<16x96xf32> to vector<16x32xf32>
    %35 = vector.shape_cast %32 : vector<16x32xf32> to vector<2x8x32xf32>
    %36 = vector.shape_cast %33 : vector<16x32xf32> to vector<2x8x32xf32>
    %37 = vector.shape_cast %34 : vector<16x32xf32> to vector<2x8x32xf32>
    %38 = vector.extract_strided_slice %35 {offsets = [0, 0, 0], sizes = [2, 8, 8], strides = [1, 1, 1]} : vector<2x8x32xf32> to vector<2x8x8xf32>
    %39 = vector.extract_strided_slice %35 {offsets = [0, 0, 8], sizes = [2, 8, 8], strides = [1, 1, 1]} : vector<2x8x32xf32> to vector<2x8x8xf32>
    %40 = vector.extract_strided_slice %35 {offsets = [0, 0, 16], sizes = [2, 8, 8], strides = [1, 1, 1]} : vector<2x8x32xf32> to vector<2x8x8xf32>
    %41 = vector.extract_strided_slice %35 {offsets = [0, 0, 24], sizes = [2, 8, 8], strides = [1, 1, 1]} : vector<2x8x32xf32> to vector<2x8x8xf32>
    %42 = tpu.concatenate %38, %39, %40, %41 in 0 : vector<2x8x8xf32>, vector<2x8x8xf32>, vector<2x8x8xf32>, vector<2x8x8xf32> -> vector<8x8x8xf32>
    %43 = vector.extract_strided_slice %36 {offsets = [0, 0, 0], sizes = [2, 8, 8], strides = [1, 1, 1]} : vector<2x8x32xf32> to vector<2x8x8xf32>
    %44 = vector.extract_strided_slice %36 {offsets = [0, 0, 8], sizes = [2, 8, 8], strides = [1, 1, 1]} : vector<2x8x32xf32> to vector<2x8x8xf32>
    %45 = vector.extract_strided_slice %36 {offsets = [0, 0, 16], sizes = [2, 8, 8], strides = [1, 1, 1]} : vector<2x8x32xf32> to vector<2x8x8xf32>
    %46 = vector.extract_strided_slice %36 {offsets = [0, 0, 24], sizes = [2, 8, 8], strides = [1, 1, 1]} : vector<2x8x32xf32> to vector<2x8x8xf32>
    %47 = tpu.concatenate %43, %44, %45, %46 in 0 : vector<2x8x8xf32>, vector<2x8x8xf32>, vector<2x8x8xf32>, vector<2x8x8xf32> -> vector<8x8x8xf32>
    %48 = vector.extract_strided_slice %37 {offsets = [0, 0, 0], sizes = [2, 8, 8], strides = [1, 1, 1]} : vector<2x8x32xf32> to vector<2x8x8xf32>
    %49 = vector.extract_strided_slice %37 {offsets = [0, 0, 8], sizes = [2, 8, 8], strides = [1, 1, 1]} : vector<2x8x32xf32> to vector<2x8x8xf32>
    %50 = vector.extract_strided_slice %37 {offsets = [0, 0, 16], sizes = [2, 8, 8], strides = [1, 1, 1]} : vector<2x8x32xf32> to vector<2x8x8xf32>
    %51 = vector.extract_strided_slice %37 {offsets = [0, 0, 24], sizes = [2, 8, 8], strides = [1, 1, 1]} : vector<2x8x32xf32> to vector<2x8x8xf32>
    %52 = tpu.concatenate %48, %49, %50, %51 in 0 : vector<2x8x8xf32>, vector<2x8x8xf32>, vector<2x8x8xf32>, vector<2x8x8xf32> -> vector<8x8x8xf32>
    %53 = arith.truncf %42 : vector<8x8x8xf32> to vector<8x8x8xbf16>
    %54 = arith.truncf %47 : vector<8x8x8xf32> to vector<8x8x8xbf16>
    "tpu.trace_start"() <{level = 10 : i32, message = "bqd,bkd->bqk"}> : () -> ()
    %cst_27 = arith.constant dense<0.000000e+00> : vector<8x8x8xf32>
    %55 = tpu.matmul %53, %54, %cst_27 {dimension_numbers = #tpu.dot_dimension_numbers<[2], [2], [1], [1], [0, 0, 0, 1, 1, 1], [0], [0]>} : vector<8x8x8xbf16>, vector<8x8x8xbf16>, vector<8x8x8xf32> -> vector<8x8x8xf32>
    "tpu.trace_stop"() : () -> ()
    %56 = vector.shape_cast %27 : vector<8x8xf32> to vector<1x8x8xf32>
    %57 = vector.broadcast %56 : vector<1x8x8xf32> to vector<8x8x8xf32>
    %58 = arith.addf %55, %57 : vector<8x8x8xf32>
    %cst_28 = arith.constant dense<0xFF800000> : vector<8x8xf32>
    %59 = vector.multi_reduction <maximumf>, %58, %cst_28 [2] : vector<8x8x8xf32> to vector<8x8xf32>
    %60 = vector.shape_cast %59 : vector<8x8xf32> to vector<8x8x1xf32>
    %61 = vector.broadcast %60 : vector<8x8x1xf32> to vector<8x8x8xf32>
    %62 = arith.subf %58, %61 : vector<8x8x8xf32>
    %63 = math.exp %62 : vector<8x8x8xf32>
    %cst_29 = arith.constant dense<0.000000e+00> : vector<8x8xf32>
    %64 = vector.multi_reduction <add>, %63, %cst_29 [2] : vector<8x8x8xf32> to vector<8x8xf32>
    %65 = vector.shape_cast %64 : vector<8x8xf32> to vector<8x8x1xf32>
    %66 = tpu.reciprocal %65 {approx = true} : vector<8x8x1xf32> -> vector<8x8x1xf32>
    %67 = vector.broadcast %66 : vector<8x8x1xf32> to vector<8x8x8xf32>
    %68 = arith.mulf %63, %67 : vector<8x8x8xf32>
    %69 = arith.truncf %68 : vector<8x8x8xf32> to vector<8x8x8xbf16>
    %70 = arith.truncf %52 : vector<8x8x8xf32> to vector<8x8x8xbf16>
    "tpu.trace_start"() <{level = 10 : i32, message = "bqk,bkd->bqd"}> : () -> ()
    %cst_30 = arith.constant dense<0.000000e+00> : vector<8x8x8xf32>
    %71 = tpu.matmul %69, %70, %cst_30 {dimension_numbers = #tpu.dot_dimension_numbers<[2], [1], [1], [2], [0, 0, 0, 1, 1, 2], [0], [0]>} : vector<8x8x8xbf16>, vector<8x8x8xbf16>, vector<8x8x8xf32> -> vector<8x8x8xf32>
    "tpu.trace_stop"() : () -> ()
    %72 = vector.extract_strided_slice %71 {offsets = [0, 0, 0], sizes = [2, 8, 8], strides = [1, 1, 1]} : vector<8x8x8xf32> to vector<2x8x8xf32>
    %73 = vector.extract_strided_slice %71 {offsets = [2, 0, 0], sizes = [2, 8, 8], strides = [1, 1, 1]} : vector<8x8x8xf32> to vector<2x8x8xf32>
    %74 = vector.extract_strided_slice %71 {offsets = [4, 0, 0], sizes = [2, 8, 8], strides = [1, 1, 1]} : vector<8x8x8xf32> to vector<2x8x8xf32>
    %75 = vector.extract_strided_slice %71 {offsets = [6, 0, 0], sizes = [2, 8, 8], strides = [1, 1, 1]} : vector<8x8x8xf32> to vector<2x8x8xf32>
    %76 = tpu.concatenate %72, %73, %74, %75 in 2 : vector<2x8x8xf32>, vector<2x8x8xf32>, vector<2x8x8xf32>, vector<2x8x8xf32> -> vector<2x8x32xf32>
    %77 = vector.shape_cast %76 : vector<2x8x32xf32> to vector<16x32xf32>
    %78 = arith.truncf %77 : vector<16x32xf32> to vector<16x32xbf16>
    %cst_31 = arith.constant dense<0.000000e+00> : vector<16x32xf32>
    %79 = tpu.matmul %78, %3, %cst_31 {dimension_numbers = #tpu.dot_dimension_numbers<[1], [0], [0], [1], [0, 0, 1, 1], [], []>} : vector<16x32xbf16>, vector<32x32xbf16>, vector<16x32xf32> -> vector<16x32xf32>
    %80 = vector.broadcast %10 : vector<1x32xf32> to vector<16x32xf32>
    %81 = arith.addf %79, %80 : vector<16x32xf32>
    %82 = arith.addf %0, %81 : vector<16x32xf32>
    %cst_32 = arith.constant dense<0.000000e+00> : vector<16xf32>
    %83 = vector.multi_reduction <add>, %82, %cst_32 [1] : vector<16x32xf32> to vector<16xf32>
    %84 = vector.shape_cast %83 : vector<16xf32> to vector<16x1xf32>
    %cst_33 = arith.constant 3.200000e+01 : f32
    %85 = vector.broadcast %cst_33 : f32 to vector<16x1xf32>
    %86 = arith.divf %84, %85 : vector<16x1xf32>
    %87 = vector.broadcast %86 : vector<16x1xf32> to vector<16x32xf32>
    %88 = arith.subf %82, %87 : vector<16x32xf32>
    %89 = arith.mulf %88, %88 : vector<16x32xf32>
    %cst_34 = arith.constant dense<0.000000e+00> : vector<16xf32>
    %90 = vector.multi_reduction <add>, %89, %cst_34 [1] : vector<16x32xf32> to vector<16xf32>
    %91 = vector.shape_cast %90 : vector<16xf32> to vector<16x1xf32>
    %cst_35 = arith.constant 3.200000e+01 : f32
    %92 = vector.broadcast %cst_35 : f32 to vector<16x1xf32>
    %93 = arith.divf %91, %92 : vector<16x1xf32>
    %94 = vector.broadcast %86 : vector<16x1xf32> to vector<16x32xf32>
    %95 = arith.subf %82, %94 : vector<16x32xf32>
    %cst_36 = arith.constant 9.99999974E-6 : f32
    %96 = vector.broadcast %cst_36 : f32 to vector<16x1xf32>
    %97 = arith.addf %93, %96 : vector<16x1xf32>
    %98 = math.rsqrt %97 : vector<16x1xf32>
    %99 = vector.broadcast %98 : vector<16x1xf32> to vector<16x32xf32>
    %100 = arith.mulf %95, %99 : vector<16x32xf32>
    %101 = vector.broadcast %16 : vector<1x32xf32> to vector<16x32xf32>
    %102 = arith.mulf %100, %101 : vector<16x32xf32>
    %103 = vector.broadcast %17 : vector<1x32xf32> to vector<16x32xf32>
    %104 = arith.addf %102, %103 : vector<16x32xf32>
    %105 = arith.truncf %104 : vector<16x32xf32> to vector<16x32xbf16>
    %cst_37 = arith.constant dense<0.000000e+00> : vector<16x32xf32>
    %106 = tpu.matmul %105, %4, %cst_37 {dimension_numbers = #tpu.dot_dimension_numbers<[1], [0], [0], [1], [0, 0, 1, 1], [], []>} : vector<16x32xbf16>, vector<32x32xbf16>, vector<16x32xf32> -> vector<16x32xf32>
    %107 = vector.broadcast %11 : vector<1x32xf32> to vector<16x32xf32>
    %108 = arith.addf %106, %107 : vector<16x32xf32>
    %109 = arith.truncf %1 : vector<16x32xf32> to vector<16x32xbf16>
    %cst_38 = arith.constant dense<0.000000e+00> : vector<16x64xf32>
    %110 = tpu.matmul %109, %5, %cst_38 {dimension_numbers = #tpu.dot_dimension_numbers<[1], [0], [0], [1], [0, 0, 1, 1], [], []>} : vector<16x32xbf16>, vector<32x64xbf16>, vector<16x64xf32> -> vector<16x64xf32>
    %111 = vector.broadcast %12 : vector<1x64xf32> to vector<16x64xf32>
    %112 = arith.addf %110, %111 : vector<16x64xf32>
    %113 = vector.extract_strided_slice %112 {offsets = [0, 0], sizes = [16, 32], strides = [1, 1]} : vector<16x64xf32> to vector<16x32xf32>
    %114 = vector.extract_strided_slice %112 {offsets = [0, 32], sizes = [16, 32], strides = [1, 1]} : vector<16x64xf32> to vector<16x32xf32>
    %115 = vector.shape_cast %108 : vector<16x32xf32> to vector<2x8x32xf32>
    %116 = vector.shape_cast %113 : vector<16x32xf32> to vector<2x8x32xf32>
    %117 = vector.shape_cast %114 : vector<16x32xf32> to vector<2x8x32xf32>
    %118 = vector.extract_strided_slice %115 {offsets = [0, 0, 0], sizes = [2, 8, 8], strides = [1, 1, 1]} : vector<2x8x32xf32> to vector<2x8x8xf32>
    %119 = vector.extract_strided_slice %115 {offsets = [0, 0, 8], sizes = [2, 8, 8], strides = [1, 1, 1]} : vector<2x8x32xf32> to vector<2x8x8xf32>
    %120 = vector.extract_strided_slice %115 {offsets = [0, 0, 16], sizes = [2, 8, 8], strides = [1, 1, 1]} : vector<2x8x32xf32> to vector<2x8x8xf32>
    %121 = vector.extract_strided_slice %115 {offsets = [0, 0, 24], sizes = [2, 8, 8], strides = [1, 1, 1]} : vector<2x8x32xf32> to vector<2x8x8xf32>
    %122 = tpu.concatenate %118, %119, %120, %121 in 0 : vector<2x8x8xf32>, vector<2x8x8xf32>, vector<2x8x8xf32>, vector<2x8x8xf32> -> vector<8x8x8xf32>
    %123 = vector.extract_strided_slice %116 {offsets = [0, 0, 0], sizes = [2, 8, 8], strides = [1, 1, 1]} : vector<2x8x32xf32> to vector<2x8x8xf32>
    %124 = vector.extract_strided_slice %116 {offsets = [0, 0, 8], sizes = [2, 8, 8], strides = [1, 1, 1]} : vector<2x8x32xf32> to vector<2x8x8xf32>
    %125 = vector.extract_strided_slice %116 {offsets = [0, 0, 16], sizes = [2, 8, 8], strides = [1, 1, 1]} : vector<2x8x32xf32> to vector<2x8x8xf32>
    %126 = vector.extract_strided_slice %116 {offsets = [0, 0, 24], sizes = [2, 8, 8], strides = [1, 1, 1]} : vector<2x8x32xf32> to vector<2x8x8xf32>
    %127 = tpu.concatenate %123, %124, %125, %126 in 0 : vector<2x8x8xf32>, vector<2x8x8xf32>, vector<2x8x8xf32>, vector<2x8x8xf32> -> vector<8x8x8xf32>
    %128 = vector.extract_strided_slice %117 {offsets = [0, 0, 0], sizes = [2, 8, 8], strides = [1, 1, 1]} : vector<2x8x32xf32> to vector<2x8x8xf32>
    %129 = vector.extract_strided_slice %117 {offsets = [0, 0, 8], sizes = [2, 8, 8], strides = [1, 1, 1]} : vector<2x8x32xf32> to vector<2x8x8xf32>
    %130 = vector.extract_strided_slice %117 {offsets = [0, 0, 16], sizes = [2, 8, 8], strides = [1, 1, 1]} : vector<2x8x32xf32> to vector<2x8x8xf32>
    %131 = vector.extract_strided_slice %117 {offsets = [0, 0, 24], sizes = [2, 8, 8], strides = [1, 1, 1]} : vector<2x8x32xf32> to vector<2x8x8xf32>
    %132 = tpu.concatenate %128, %129, %130, %131 in 0 : vector<2x8x8xf32>, vector<2x8x8xf32>, vector<2x8x8xf32>, vector<2x8x8xf32> -> vector<8x8x8xf32>
    %133 = arith.truncf %122 : vector<8x8x8xf32> to vector<8x8x8xbf16>
    %134 = arith.truncf %127 : vector<8x8x8xf32> to vector<8x8x8xbf16>
    "tpu.trace_start"() <{level = 10 : i32, message = "bqd,bkd->bqk"}> : () -> ()
    %cst_39 = arith.constant dense<0.000000e+00> : vector<8x8x8xf32>
    %135 = tpu.matmul %133, %134, %cst_39 {dimension_numbers = #tpu.dot_dimension_numbers<[2], [2], [1], [1], [0, 0, 0, 1, 1, 1], [0], [0]>} : vector<8x8x8xbf16>, vector<8x8x8xbf16>, vector<8x8x8xf32> -> vector<8x8x8xf32>
    "tpu.trace_stop"() : () -> ()
    %cst_40 = arith.constant dense<0xFF800000> : vector<8x8xf32>
    %136 = vector.multi_reduction <maximumf>, %135, %cst_40 [2] : vector<8x8x8xf32> to vector<8x8xf32>
    %137 = vector.shape_cast %136 : vector<8x8xf32> to vector<8x8x1xf32>
    %138 = vector.broadcast %137 : vector<8x8x1xf32> to vector<8x8x8xf32>
    %139 = arith.subf %135, %138 : vector<8x8x8xf32>
    %140 = math.exp %139 : vector<8x8x8xf32>
    %cst_41 = arith.constant dense<0.000000e+00> : vector<8x8xf32>
    %141 = vector.multi_reduction <add>, %140, %cst_41 [2] : vector<8x8x8xf32> to vector<8x8xf32>
    %142 = vector.shape_cast %141 : vector<8x8xf32> to vector<8x8x1xf32>
    %143 = tpu.reciprocal %142 {approx = true} : vector<8x8x1xf32> -> vector<8x8x1xf32>
    %144 = vector.broadcast %143 : vector<8x8x1xf32> to vector<8x8x8xf32>
    %145 = arith.mulf %140, %144 : vector<8x8x8xf32>
    %146 = arith.truncf %145 : vector<8x8x8xf32> to vector<8x8x8xbf16>
    %147 = arith.truncf %132 : vector<8x8x8xf32> to vector<8x8x8xbf16>
    "tpu.trace_start"() <{level = 10 : i32, message = "bqk,bkd->bqd"}> : () -> ()
    %cst_42 = arith.constant dense<0.000000e+00> : vector<8x8x8xf32>
    %148 = tpu.matmul %146, %147, %cst_42 {dimension_numbers = #tpu.dot_dimension_numbers<[2], [1], [1], [2], [0, 0, 0, 1, 1, 2], [0], [0]>} : vector<8x8x8xbf16>, vector<8x8x8xbf16>, vector<8x8x8xf32> -> vector<8x8x8xf32>
    "tpu.trace_stop"() : () -> ()
    %149 = vector.extract_strided_slice %148 {offsets = [0, 0, 0], sizes = [2, 8, 8], strides = [1, 1, 1]} : vector<8x8x8xf32> to vector<2x8x8xf32>
    %150 = vector.extract_strided_slice %148 {offsets = [2, 0, 0], sizes = [2, 8, 8], strides = [1, 1, 1]} : vector<8x8x8xf32> to vector<2x8x8xf32>
    %151 = vector.extract_strided_slice %148 {offsets = [4, 0, 0], sizes = [2, 8, 8], strides = [1, 1, 1]} : vector<8x8x8xf32> to vector<2x8x8xf32>
    %152 = vector.extract_strided_slice %148 {offsets = [6, 0, 0], sizes = [2, 8, 8], strides = [1, 1, 1]} : vector<8x8x8xf32> to vector<2x8x8xf32>
    %153 = tpu.concatenate %149, %150, %151, %152 in 2 : vector<2x8x8xf32>, vector<2x8x8xf32>, vector<2x8x8xf32>, vector<2x8x8xf32> -> vector<2x8x32xf32>
    %154 = vector.shape_cast %153 : vector<2x8x32xf32> to vector<16x32xf32>
    %155 = arith.truncf %154 : vector<16x32xf32> to vector<16x32xbf16>
    %cst_43 = arith.constant dense<0.000000e+00> : vector<16x32xf32>
    %156 = tpu.matmul %155, %6, %cst_43 {dimension_numbers = #tpu.dot_dimension_numbers<[1], [0], [0], [1], [0, 0, 1, 1], [], []>} : vector<16x32xbf16>, vector<32x32xbf16>, vector<16x32xf32> -> vector<16x32xf32>
    %157 = vector.broadcast %13 : vector<1x32xf32> to vector<16x32xf32>
    %158 = arith.addf %156, %157 : vector<16x32xf32>
    %159 = arith.addf %104, %158 : vector<16x32xf32>
    %cst_44 = arith.constant dense<0.000000e+00> : vector<16xf32>
    %160 = vector.multi_reduction <add>, %159, %cst_44 [1] : vector<16x32xf32> to vector<16xf32>
    %161 = vector.shape_cast %160 : vector<16xf32> to vector<16x1xf32>
    %cst_45 = arith.constant 3.200000e+01 : f32
    %162 = vector.broadcast %cst_45 : f32 to vector<16x1xf32>
    %163 = arith.divf %161, %162 : vector<16x1xf32>
    %164 = vector.broadcast %163 : vector<16x1xf32> to vector<16x32xf32>
    %165 = arith.subf %159, %164 : vector<16x32xf32>
    %166 = arith.mulf %165, %165 : vector<16x32xf32>
    %cst_46 = arith.constant dense<0.000000e+00> : vector<16xf32>
    %167 = vector.multi_reduction <add>, %166, %cst_46 [1] : vector<16x32xf32> to vector<16xf32>
    %168 = vector.shape_cast %167 : vector<16xf32> to vector<16x1xf32>
    %cst_47 = arith.constant 3.200000e+01 : f32
    %169 = vector.broadcast %cst_47 : f32 to vector<16x1xf32>
    %170 = arith.divf %168, %169 : vector<16x1xf32>
    %171 = vector.broadcast %163 : vector<16x1xf32> to vector<16x32xf32>
    %172 = arith.subf %159, %171 : vector<16x32xf32>
    %cst_48 = arith.constant 9.99999974E-6 : f32
    %173 = vector.broadcast %cst_48 : f32 to vector<16x1xf32>
    %174 = arith.addf %170, %173 : vector<16x1xf32>
    %175 = math.rsqrt %174 : vector<16x1xf32>
    %176 = vector.broadcast %175 : vector<16x1xf32> to vector<16x32xf32>
    %177 = arith.mulf %172, %176 : vector<16x32xf32>
    %178 = vector.broadcast %18 : vector<1x32xf32> to vector<16x32xf32>
    %179 = arith.mulf %177, %178 : vector<16x32xf32>
    %180 = vector.broadcast %19 : vector<1x32xf32> to vector<16x32xf32>
    %181 = arith.addf %179, %180 : vector<16x32xf32>
    %182 = arith.truncf %181 : vector<16x32xf32> to vector<16x32xbf16>
    %cst_49 = arith.constant dense<0.000000e+00> : vector<16x64xf32>
    %183 = tpu.matmul %182, %7, %cst_49 {dimension_numbers = #tpu.dot_dimension_numbers<[1], [0], [0], [1], [0, 0, 1, 1], [], []>} : vector<16x32xbf16>, vector<32x64xbf16>, vector<16x64xf32> -> vector<16x64xf32>
    %184 = vector.broadcast %14 : vector<1x64xf32> to vector<16x64xf32>
    %185 = arith.addf %183, %184 : vector<16x64xf32>
    %cst_50 = arith.constant 0.000000e+00 : f32
    %186 = vector.broadcast %cst_50 : f32 to vector<16x64xf32>
    %187 = arith.maximumf %185, %186 : vector<16x64xf32>
    %188 = arith.truncf %187 : vector<16x64xf32> to vector<16x64xbf16>
    %cst_51 = arith.constant dense<0.000000e+00> : vector<16x32xf32>
    %189 = tpu.matmul %188, %8, %cst_51 {dimension_numbers = #tpu.dot_dimension_numbers<[1], [0], [0], [1], [0, 0, 1, 1], [], []>} : vector<16x64xbf16>, vector<64x32xbf16>, vector<16x32xf32> -> vector<16x32xf32>
    %190 = vector.broadcast %15 : vector<1x32xf32> to vector<16x32xf32>
    %191 = arith.addf %189, %190 : vector<16x32xf32>
    %192 = arith.addf %181, %191 : vector<16x32xf32>
    %cst_52 = arith.constant dense<0.000000e+00> : vector<16xf32>
    %193 = vector.multi_reduction <add>, %192, %cst_52 [1] : vector<16x32xf32> to vector<16xf32>
    %194 = vector.shape_cast %193 : vector<16xf32> to vector<16x1xf32>
    %cst_53 = arith.constant 3.200000e+01 : f32
    %195 = vector.broadcast %cst_53 : f32 to vector<16x1xf32>
    %196 = arith.divf %194, %195 : vector<16x1xf32>
    %197 = vector.broadcast %196 : vector<16x1xf32> to vector<16x32xf32>
    %198 = arith.subf %192, %197 : vector<16x32xf32>
    %199 = arith.mulf %198, %198 : vector<16x32xf32>
    %cst_54 = arith.constant dense<0.000000e+00> : vector<16xf32>
    %200 = vector.multi_reduction <add>, %199, %cst_54 [1] : vector<16x32xf32> to vector<16xf32>
    %201 = vector.shape_cast %200 : vector<16xf32> to vector<16x1xf32>
    %cst_55 = arith.constant 3.200000e+01 : f32
    %202 = vector.broadcast %cst_55 : f32 to vector<16x1xf32>
    %203 = arith.divf %201, %202 : vector<16x1xf32>
    %204 = vector.broadcast %196 : vector<16x1xf32> to vector<16x32xf32>
    %205 = arith.subf %192, %204 : vector<16x32xf32>
    %cst_56 = arith.constant 9.99999974E-6 : f32
    %206 = vector.broadcast %cst_56 : f32 to vector<16x1xf32>
    %207 = arith.addf %203, %206 : vector<16x1xf32>
    %208 = math.rsqrt %207 : vector<16x1xf32>
    %209 = vector.broadcast %208 : vector<16x1xf32> to vector<16x32xf32>
    %210 = arith.mulf %205, %209 : vector<16x32xf32>
    %211 = vector.broadcast %20 : vector<1x32xf32> to vector<16x32xf32>
    %212 = arith.mulf %210, %211 : vector<16x32xf32>
    %213 = vector.broadcast %21 : vector<1x32xf32> to vector<16x32xf32>
    %214 = arith.addf %212, %213 : vector<16x32xf32>
    %c0_57 = arith.constant 0 : index
    %c0_58 = arith.constant 0 : index
    %215 = vector.load %arg4[%c0_57, %c0_58] : memref<16x32xf32, #tpu.memory_space<vmem>>, vector<16x32xf32>
    tpu.vector_store %arg4[%c0_57, %c0_58], %214 {strides = array<i32>} : memref<16x32xf32, #tpu.memory_space<vmem>>, vector<16x32xf32>,
    return
  }
}

</mosaic_0001>

<bundles_post_ra>
// kernel: decoder_layer.1
= control target key start
LH: loop header
LB: loop body
LE: loop exit
PB: predicated region body
PF: predicated region fallthrough
CT: control target
= control target key end

     0   :  { %9 = vsyncpa [#allocation3], 0  ;;  %s3841_s0 = inlined_call_operand.hbm [shape: f32[16,32], index: 0, kind: input, shape index: {}]   ;;  %s3842_s1 = inlined_call_operand.hbm [shape: f32[16,32], index: 1, kind: input, shape index: {}]   ;;  %s3843_s2 = inlined_call_operand.hbm [shape: bf16[64,896], index: 2, kind: input, shape index: {}]   ;;  %s3844_s3 = inlined_call_operand.vmem [shape: f32[16,128], index: 3, kind: input, shape index: {}]   ;;  %s3845_s4 = inlined_call_operand.hbm [shape: f32[16,32], index: 4, kind: output, shape index: {}]  }
   0x1   :  { %10 = vsyncpa [#allocation6], 0 }
   0x2   :  { %11 = vsyncpa [#allocation4], 0  ;;  %s3260_s15 = smov [#allocation5]   ;;  %s3261_s17 = smov [#allocation2]  }
   0x3   :  { %s29_s16 = sshll.u32 %s3260_s15, 4  ;;  %s17_s18 = sshll.u32 %s3261_s17, 4  ;;  %s30_s16 = int_to_ptr.vmem [resolvable:$true] %s29_s16  ;;  %s3302_s18 = int_to_ptr.vmem [resolvable:$true] %s17_s18 }
   0x4   :  { %s3166_s21 = scalar_lea.hbm %s3842_s1, 256 }
   0x5   :  { %p3167_p0 = scmp.ne.s32.totalorder %s3842_s1, %s3166_s21  ;;  %p3170_p1 = scmp.lt.u32.totalorder %s3166_s21, %s3842_s1 }
   0x7   :  { %p3172_p2 = pnand %p3170_p1, %p3167_p0 }
   0x9   :  { %3175 = shalt.err (!%p3172_p2)
}
   0xa   :  { %s3176_s26 = scalar_lea.vmem %s30_s16, 256  ;;  %p3181_p4 = scmp.lt.s32.totalorder %s30_s16, %s30_s16 }
   0xb   :  { %p3177_p3 = scmp.ne.s32.totalorder %s30_s16, %s3176_s26  ;;  %p3182_p5 = scmp.lt.s32.totalorder %s3176_s26, %s3176_s26 }
   0xd   :  { %p3183_p6 = por %p3182_p5, %p3181_p4 }
   0xf   :  { %p3184_p7 = pnand %p3183_p6, %p3177_p3 }
  0x11   :  { %3187 = shalt.err (!%p3184_p7)
}
  0x12   :  { %s3262_s27 = smov 128   ;;  %s3263_s28 = smov 8  }
  0x13   :  { %35 = dma.hbm_to_vmem [thread:$0]  %s3842_s1, 256, %s30_s16, [#allocation6], %s3262_s27, %s3262_s27, %s3263_s28  }
  0x14   :  { %s3188_s7 = scalar_lea.hbm %s3841_s0, 256 }
  0x15   :  { %p3189_p8 = scmp.ne.s32.totalorder %s3841_s0, %s3188_s7  ;;  %p3192_p9 = scmp.lt.u32.totalorder %s3188_s7, %s3841_s0 }
  0x17   :  { %p3194_p10 = pnand %p3192_p9, %p3189_p8 }
  0x19   :  { %3197 = shalt.err (!%p3194_p10)
}
  0x1a   :  { %s3198_s12 = scalar_lea.vmem %s3302_s18, 256  ;;  %p3203_p12 = scmp.lt.s32.totalorder %s3302_s18, %s3302_s18 }
  0x1b   :  { %p3199_p11 = scmp.ne.s32.totalorder %s3302_s18, %s3198_s12  ;;  %p3204_p13 = scmp.lt.s32.totalorder %s3198_s12, %s3198_s12 }
  0x1d   :  { %p3205_p0 = por %p3204_p13, %p3203_p12 }
  0x1f   :  { %p3206_p1 = pnand %p3205_p0, %p3199_p11 }
  0x21   :  { %3209 = shalt.err (!%p3206_p1)
}
  0x22   :  { %23 = dma.hbm_to_vmem [thread:$0]  %s3841_s0, 256, %s3302_s18, [#allocation3], %s3262_s27, %s3262_s27, %s3263_s28  }
  0x23   :  { %s3264_s14 = smov [#allocation7]   ;;  %s3210_s19 = scalar_lea.hbm %s3843_s2, 3584 }
  0x24   :  { %s41_s15 = sshll.u32 %s3264_s14, 4  ;;  %p3211_p2 = scmp.ne.s32.totalorder %s3843_s2, %s3210_s19  ;;  %s42_s15 = int_to_ptr.vmem [resolvable:$true] %s41_s15 }
  0x25   :  { %p3214_p3 = scmp.lt.u32.totalorder %s3210_s19, %s3843_s2 }
  0x27   :  { %p3216_p4 = pnand %p3214_p3, %p3211_p2 }
  0x29   :  { %3219 = shalt.err (!%p3216_p4)
}
  0x2a   :  { %s3220_s24 = scalar_lea.vmem %s42_s15, 3584  ;;  %p3225_p6 = scmp.lt.s32.totalorder %s42_s15, %s42_s15 }
  0x2b   :  { %p3221_p5 = scmp.ne.s32.totalorder %s42_s15, %s3220_s24  ;;  %p3226_p7 = scmp.lt.s32.totalorder %s3220_s24, %s3220_s24 }
  0x2d   :  { %p3227_p8 = por %p3226_p7, %p3225_p6 }
  0x2f   :  { %p3228_p9 = pnand %p3227_p8, %p3221_p5 }
  0x31   :  { %3231 = shalt.err (!%p3228_p9)
}
  0x32   :  { %s3265_s0 = smov 448   ;;  %s3266_s18 = smov 28  }
  0x33   :  { %47 = dma.hbm_to_vmem [thread:$0]  %s3843_s2, 3584, %s42_s15, [#allocation6], %s3265_s0, %s3265_s0, %s3266_s18  }
  0x34   :  { %3254 = dma.done.wait [#allocation3], 256  }
  0x35   :  { %3255 = vsyncadd [#allocation3], 4294967040 }
  0x36   :  { %3256 = dma.done.wait [#allocation6], 3840  }
  0x37   :  { %3257 = vsyncadd [#allocation6], 4294963456  ;;  %v3267_v0 = vmov 0.0   ;;  %vm3268_vm0 = vmmov 0   ;;  %v3074_v1 = vld [vmem:[#allocation7] ss:$28 sps:$4 sm:$0xff]   ;;  %v109_v51 = vlaneseq }
  0x38   :  { %2730 = vmatprep.subr.bf16.mxu1 %v3267_v0  ;;  %2734 = vmatprep.mubr.msk.bf16.mxu1 %vm3268_vm0, %v3267_v0  ;;  %v3075_v2 = vld [vmem:[#allocation7 + $0x38] ss:$28 sps:$4 sm:$0xff]   ;;  %v3357_v3 = vld [vmem:[#allocation2] sm:$0xff]  ;;  %v3359_v4 = vld [vmem:[#allocation2 + $0x8] sm:$0xff]  ;;  %vm132_vm1 = vcmask 261120   ;;  %s3269_s30 = smov 104  }
  0x39   :  { %2744 = vmatprep.subr.bf16.mxu0 %v3267_v0  ;;  %2746 = vmatprep.mubr.msk.bf16.mxu0 %vm3268_vm0, %v3267_v0  ;;  %v115_v5 = vpack.c.bf16 %v3359_v4, %v3357_v3  ;;  %v2575_v6 = vld [vmem:[%s3844_s3] ss:$0 sm:$0xff]  ;;  %s3270_s5 = smov 120   ;;  %s3271_s6 = smov 96   ;;  %vm208_vm2 = vcmask 64512   ;;  %vm699_vm3 = vcmask 1043456  }
  0x3a   :  { %2731 = vmatpush3.bf16.msra.mxu1 %v3074_v1  ;;  %s3272_s7 = smov 112   ;;  %s3273_s8 = smov 64   ;;  %v110_v52 = vshrl.u32 %v109_v51, 7  ;;  %v112_v53 = vand.u32 127, %v109_v51  ;;  %vm1105_vm5 = vcmask 130048   ;;  %vm1108_vm6 = vcmask 195584  }
  0x3b   :  { %2732 = vmatprep.subr.bf16.mxu1 %v3267_v0  ;;  %s3274_s9 = smov 16   ;;  %s3275_s10 = smov 24   ;;  %vm2470_vm7 = vcmask 523264  }
  0x3c   :  { %vm113_vm4 = vcmp.gt.s32.totalorder %v112_v53, %v110_v52 }
  0x3d   :  { %v114_v54 = vsel %vm113_vm4, -1e+30, %v3267_v0 }
  0x3e   :  { %2733 = vmatpush3.bf16.msra.mxu1 %v3075_v2 }
  0x3f   :  { %2738 = vmatprep.subr.bf16.mxu1 %v3267_v0 }
  0x41   :  { %2735 = vmatmul.mubr.msk.bf16.vlgmr.msra.gmra.mrb[0].mxu1 %vm132_vm1, %v115_v5 }
  0x42   :  { %2740 = vmatprep.mubr.msk.bf16.mxu1 %vm3268_vm0, %v3267_v0 }
 0x114   :  { %v170_v7 = vpop.f32.mrb[0].mxu1 }
 0x115   :  { %v2736_v8 = vpop.f32.mrb[1].mxu1  ;;  %v171_v10 = vadd.f32 %v2575_v6, %v170_v7 }
 0x116   :  { %v173_v9 = vpop.f32.mrb[2].mxu1 }
 0x117   :  { %v174_v11 = vadd.f32 %v2575_v6, %v173_v9  ;;  %v2737_v12 = vpop.f32.mrb[3].mxu1  ;;  %v197_v14 = vpack.c.bf16 %v171_v10, %v171_v10 }
 0x119   :  { %v3009_v13 = vpack.i.bf16 %v174_v11, %v171_v10  ;;  %v198_v15 = vpack.c.bf16 %v174_v11, %v174_v11 }
 0x11b   :  { %3010 = vrot.lane.b32.xlu1 %v3009_v13, %s3269_s30  ;;  %3000 = vrot.lane.b32.xlu0 %v3009_v13, %s3270_s5 }
 0x11f   :  { %206 = vrot.lane.b32.xlu1 %v197_v14, %s3271_s6  ;;  %3005 = vrot.lane.b32.xlu0 %v3009_v13, %s3272_s7 }
 0x123   :  { %256 = vrot.lane.b32.xlu0 %v198_v15, %s3271_s6 }
 0x18d   :  { %v3011_v16 = vpop.permute.xlu1 %3010  ;;  %v3001_v17 = vpop.permute.xlu0 %3000 }
 0x18e   :  { %v3003_v18 = vunpack.i.h.bf16 %v3001_v17  ;;  %v3002_v19 = vunpack.i.l.bf16 %v3001_v17  ;;  %v3012_v27 = vunpack.i.l.bf16 %v3011_v16  ;;  %v3013_v30 = vunpack.i.h.bf16 %v3011_v16 }
 0x190   :  { %v3376_v20 = vpack.c.bf16 %v3003_v18, %v3003_v18  ;;  %v3378_v21 = vpack.c.bf16 %v3002_v19, %v3002_v19  ;;  %v3395_v33 = vpack.c.bf16 %v3012_v27, %v3012_v27  ;;  %v3398_v34 = vpack.c.bf16 %v3013_v30, %v3013_v30 }
 0x191   :  { %v207_v22 = vpop.permute.xlu1 %206  ;;  %v3006_v23 = vpop.permute.xlu0 %3005 }
 0x192   :  { %v213_v24 = vsel %vm208_vm2, %v207_v22, 0  ;;  %v3008_v25 = vunpack.i.h.bf16 %v3006_v23  ;;  %v3007_v26 = vunpack.i.l.bf16 %v3006_v23  ;;  %305 = vrot.lane.b32.xlu1 %v3378_v21, %s3271_s6  ;;  %354 = vrot.lane.b32.xlu0 %v3376_v20, %s3271_s6 }
 0x193   :  { %2739 = vmatpush3.bf16.xpose.msra.mxu1 %v213_v24 }
 0x194   :  { %v3385_v28 = vpack.c.bf16 %v3008_v25, %v3008_v25  ;;  %v3387_v29 = vpack.c.bf16 %v3007_v26, %v3007_v26  ;;  %2750 = vmatprep.subr.bf16.mxu1 %v3267_v0 }
 0x195   :  { %v257_v31 = vpop.permute.xlu0 %256 }
 0x196   :  { %403 = vrot.lane.b32.xlu1 %v3387_v29, %s3271_s6  ;;  %452 = vrot.lane.b32.xlu0 %v3385_v28, %s3271_s6  ;;  %v262_v32 = vsel %vm208_vm2, %v257_v31, 0 }
 0x197   :  { %2745 = vmatpush3.bf16.xpose.msra.mxu0 %v262_v32 }
 0x198   :  { %2756 = vmatprep.subr.bf16.mxu0 %v3267_v0 }
 0x19a   :  { %2741 = vmatmul.mubr.msk.bf16.vlgmr.msra.gmra.mrb[4].mxu1 %vm208_vm2, %v197_v14  ;;  %501 = vrot.lane.b32.xlu1 %v3395_v33, %s3271_s6 }
 0x19b   :  { %550 = vrot.lane.b32.xlu0 %v3398_v34, %s3271_s6  ;;  %2752 = vmatprep.mubr.msk.bf16.mxu1 %vm3268_vm0, %v3267_v0 }
 0x19e   :  { %743 = vrot.lane.b32.xlu1 %v198_v15, %s3273_s8  ;;  %2747 = vmatmul.mubr.msk.bf16.vlgmr.msra.gmra.mrb[0].mxu0 %vm208_vm2, %v198_v15 }
 0x19f   :  { %694 = vrot.lane.b32.xlu0 %v197_v14, %s3273_s8  ;;  %2758 = vmatprep.mubr.msk.bf16.mxu0 %vm3268_vm0, %v3267_v0 }
 0x204   :  { %v306_v35 = vpop.permute.xlu1 %305  ;;  %v355_v36 = vpop.permute.xlu0 %354 }
 0x205   :  { %v311_v37 = vsel %vm208_vm2, %v306_v35, 0  ;;  %v360_v38 = vsel %vm208_vm2, %v355_v36, 0 }
 0x206   :  { %2751 = vmatpush3.bf16.xpose.msra.mxu1 %v311_v37  ;;  %2757 = vmatpush3.bf16.xpose.msra.mxu0 %v360_v38 }
 0x207   :  { %2762 = vmatprep.subr.bf16.mxu1 %v3267_v0  ;;  %2768 = vmatprep.subr.bf16.mxu0 %v3267_v0 }
 0x208   :  { %v404_v39 = vpop.permute.xlu1 %403  ;;  %v453_v40 = vpop.permute.xlu0 %452 }
 0x209   :  { %v409_v41 = vsel %vm208_vm2, %v404_v39, 0  ;;  %v458_v42 = vsel %vm208_vm2, %v453_v40, 0 }
 0x20c   :  { %v502_v43 = vpop.permute.xlu1 %501 }
 0x20d   :  { %2753 = vmatmul.mubr.msk.bf16.vlgmr.msra.gmra.mrb[8].mxu1 %vm208_vm2, %v3378_v21  ;;  %2759 = vmatmul.mubr.msk.bf16.vlgmr.msra.gmra.mrb[4].mxu0 %vm208_vm2, %v3376_v20  ;;  %v551_v44 = vpop.permute.xlu0 %550  ;;  %v507_v45 = vsel %vm208_vm2, %v502_v43, 0 }
 0x20e   :  { %2763 = vmatpush3.bf16.xpose.msra.mxu1 %v409_v41  ;;  %2769 = vmatpush3.bf16.xpose.msra.mxu0 %v458_v42  ;;  %v556_v46 = vsel %vm208_vm2, %v551_v44, 0 }
 0x20f   :  { %2764 = vmatprep.mubr.msk.bf16.mxu1 %vm3268_vm0, %v3267_v0  ;;  %2770 = vmatprep.mubr.msk.bf16.mxu0 %vm3268_vm0, %v3267_v0 }
 0x210   :  { %2774 = vmatprep.subr.bf16.mxu1 %v3267_v0  ;;  %2780 = vmatprep.subr.bf16.mxu0 %v3267_v0  ;;  %v744_v47 = vpop.permute.xlu1 %743 }
 0x211   :  { %v695_v48 = vpop.permute.xlu0 %694  ;;  %v749_v49 = vsel %vm699_vm3, %v744_v47, 0 }
 0x212   :  { %v701_v50 = vsel %vm699_vm3, %v695_v48, 0 }
 0x215   :  { %2765 = vmatmul.mubr.msk.bf16.vlgmr.msra.gmra.mrb[12].mxu1 %vm208_vm2, %v3387_v29  ;;  %2771 = vmatmul.mubr.msk.bf16.vlgmr.msra.gmra.mrb[8].mxu0 %vm208_vm2, %v3385_v28 }
 0x216   :  { %2775 = vmatpush3.bf16.xpose.msra.mxu1 %v507_v45  ;;  %2781 = vmatpush3.bf16.xpose.msra.mxu0 %v556_v46 }
 0x217   :  { %2776 = vmatprep.mubr.msk.bf16.mxu1 %vm3268_vm0, %v3267_v0  ;;  %2782 = vmatprep.mubr.msk.bf16.mxu0 %vm3268_vm0, %v3267_v0 }
 0x218   :  { %2786 = vmatprep.subr.bf16.mxu1 %v3267_v0  ;;  %2792 = vmatprep.subr.bf16.mxu0 %v3267_v0 }
 0x21d   :  { %2777 = vmatmul.mubr.msk.bf16.vlgmr.msra.gmra.mrb[16].mxu1 %vm208_vm2, %v3395_v33  ;;  %2783 = vmatmul.mubr.msk.bf16.vlgmr.msra.gmra.mrb[12].mxu0 %vm208_vm2, %v3398_v34 }
 0x21e   :  { %2787 = vmatpush3.bf16.msra.mxu1 %v701_v50  ;;  %2793 = vmatpush3.bf16.msra.mxu0 %v749_v49 }
 0x21f   :  { %2788 = vmatprep.mubr.msk.bf16.mxu1 %vm3268_vm0, %v3267_v0  ;;  %2794 = vmatprep.mubr.msk.bf16.mxu0 %vm3268_vm0, %v3267_v0 }
 0x220   :  { %2798 = vmatprep.subr.bf16.mxu1 %v3267_v0  ;;  %2804 = vmatprep.subr.bf16.mxu0 %v3267_v0 }
 0x26d   :  { %v249_v55 = vpop.f32.mrb[4].mxu1 }
 0x26e   :  { %v250_v56 = vadd.f32 %v249_v55, %v114_v54  ;;  %v2742_v57 = vpop.f32.mrb[5].mxu1 }
 0x26f   :  { %v252_v58 = vpop.f32.mrb[6].mxu1 }
 0x270   :  { %v2743_v59 = vpop.f32.mrb[7].mxu1  ;;  %v598_v60 = vsel %vm208_vm2, %v250_v56, -inf }
 0x271   :  { %v298_v61 = vpop.f32.mrb[0].mxu0  ;;  %599 = vmax.xlane.f32.xlu1 %v598_v60 }
 0x272   :  { %v299_v62 = vadd.f32 %v298_v61, %v114_v54  ;;  %v2748_v63 = vpop.f32.mrb[1].mxu0 }
 0x273   :  { %v301_v1 = vpop.f32.mrb[2].mxu0 }
 0x274   :  { %v2749_v2 = vpop.f32.mrb[3].mxu0  ;;  %v601_v5 = vsel %vm208_vm2, %v299_v62, -inf }
 0x275   :  { %602 = vmax.xlane.f32.xlu0 %v601_v5 }
 0x2e0   :  { %v347_v6 = vpop.f32.mrb[8].mxu1  ;;  %v396_v7 = vpop.f32.mrb[4].mxu0 }
 0x2e1   :  { %v348_v8 = vadd.f32 %v347_v6, %v114_v54  ;;  %v397_v9 = vadd.f32 %v396_v7, %v114_v54  ;;  %v2754_v10 = vpop.f32.mrb[9].mxu1  ;;  %v2760_v11 = vpop.f32.mrb[5].mxu0 }
 0x2e2   :  { %v350_v12 = vpop.f32.mrb[10].mxu1  ;;  %v399_v13 = vpop.f32.mrb[6].mxu0 }
 0x2e3   :  { %v2755_v14 = vpop.f32.mrb[11].mxu1  ;;  %v2761_v15 = vpop.f32.mrb[7].mxu0  ;;  %v607_v16 = vsel %vm208_vm2, %v397_v9, -inf  ;;  %v604_v17 = vsel %vm208_vm2, %v348_v8, -inf }
 0x2e4   :  { %608 = vmax.xlane.f32.xlu1 %v607_v16  ;;  %605 = vmax.xlane.f32.xlu0 %v604_v17 }
 0x2e8   :  { %v445_v18 = vpop.f32.mrb[12].mxu1  ;;  %v494_v19 = vpop.f32.mrb[8].mxu0 }
 0x2e9   :  { %v3457_v22 = vadd.f32 %v445_v18, %v114_v54  ;;  %v495_v23 = vadd.f32 %v494_v19, %v114_v54  ;;  %v2766_v24 = vpop.f32.mrb[13].mxu1  ;;  %v2772_v25 = vpop.f32.mrb[9].mxu0 }
 0x2ea   :  { %v448_v26 = vpop.f32.mrb[14].mxu1  ;;  %v497_v27 = vpop.f32.mrb[10].mxu0 }
 0x2eb   :  { %v2767_v30 = vpop.f32.mrb[15].mxu1  ;;  %v2773_v31 = vpop.f32.mrb[11].mxu0  ;;  %v613_v32 = vsel %vm208_vm2, %v495_v23, -inf  ;;  %v610_v35 = vsel %vm208_vm2, %v3457_v22, -inf }
 0x2ec   :  { %614 = vmax.xlane.f32.xlu1 %v613_v32  ;;  %611 = vmax.xlane.f32.xlu0 %v610_v35 }
 0x2f0   :  { %v543_v36 = vpop.f32.mrb[16].mxu1  ;;  %v592_v37 = vpop.f32.mrb[12].mxu0 }
 0x2f1   :  { %v3462_v38 = vadd.f32 %v543_v36, %v114_v54  ;;  %v593_v39 = vadd.f32 %v592_v37, %v114_v54  ;;  %v2778_v40 = vpop.f32.mrb[17].mxu1  ;;  %v2784_v41 = vpop.f32.mrb[13].mxu0 }
 0x2f2   :  { %v546_v42 = vpop.f32.mrb[18].mxu1  ;;  %v595_v43 = vpop.f32.mrb[14].mxu0 }
 0x2f3   :  { %v2779_v44 = vpop.f32.mrb[19].mxu1  ;;  %v2785_v45 = vpop.f32.mrb[15].mxu0  ;;  %v619_v46 = vsel %vm208_vm2, %v593_v39, -inf  ;;  %v616_v47 = vsel %vm208_vm2, %v3462_v38, -inf }
 0x2f4   :  { %620 = vmax.xlane.f32.xlu1 %v619_v46  ;;  %617 = vmax.xlane.f32.xlu0 %v616_v47 }
 0x2fe   :  { %v600_v48 = vpop.xlane.xlu1 %599 }
 0x2ff   :  { %v622_v50 = vsub.f32 %v250_v56, %v600_v48 }
 0x301   :  { %v630_v52 = vmul.f32 1.442695, %v622_v50 }
 0x302   :  { %v603_v49 = vpop.xlane.xlu0 %602 }
 0x303   :  { %v623_v51 = vsub.f32 %v299_v62, %v603_v49  ;;  %3090 = vpow2.f32 %v630_v52 }
 0x305   :  { %791 = vrot.lane.b32.xlu1 %v3378_v21, %s3273_s8  ;;  %v632_v53 = vmul.f32 1.442695, %v623_v51 }
 0x307   :  { %3092 = vpow2.f32 %v632_v53 }
 0x30a   :  { %839 = vrot.lane.b32.xlu0 %v3376_v20, %s3273_s8 }
 0x30d   :  { %v3091_v54 = vpop.eup %3090 }
 0x30e   :  { %v646_v58 = vsel %vm208_vm2, %v3091_v54, 0.0 }
 0x311   :  { %v3093_v55 = vpop.eup %3092 }
 0x312   :  { %v649_v57 = vsel %vm208_vm2, %v3093_v55, 0.0 }
 0x329   :  { %650 = vadd.xlane.f32.xlu1 %v649_v57  ;;  %647 = vadd.xlane.f32.xlu0 %v646_v58 }
 0x33a   :  { %887 = vrot.lane.b32.xlu1 %v3387_v29, %s3273_s8 }
 0x371   :  { %v609_v20 = vpop.xlane.xlu1 %608  ;;  %v606_v21 = vpop.xlane.xlu0 %605 }
 0x372   :  { %v625_v59 = vsub.f32 %v397_v9, %v609_v20  ;;  %v624_v56 = vsub.f32 %v348_v8, %v606_v21 }
 0x374   :  { %v636_v60 = vmul.f32 1.442695, %v625_v59  ;;  %v634_v61 = vmul.f32 1.442695, %v624_v56 }
 0x376   :  { %3094 = vpow2.f32 %v636_v60 }
 0x377   :  { %3096 = vpow2.f32 %v634_v61 }
 0x379   :  { %v615_v62 = vpop.xlane.xlu1 %614  ;;  %v612_v14 = vpop.xlane.xlu0 %611 }
 0x37a   :  { %v627_v63 = vsub.f32 %v495_v23, %v615_v62  ;;  %v626_v15 = vsub.f32 %v3457_v22, %v612_v14 }
 0x37c   :  { %v640_v1 = vmul.f32 1.442695, %v627_v63  ;;  %v638_v17 = vmul.f32 1.442695, %v626_v15 }
 0x37e   :  { %3098 = vpow2.f32 %v640_v1 }
 0x380   :  { %v3475_v2 = vpop.eup %3094 }
 0x381   :  { %v3477_v5 = vpop.eup %3096  ;;  %v621_v6 = vpop.xlane.xlu1 %620  ;;  %v655_v29 = vsel %vm208_vm2, %v3475_v2, 0.0 }
 0x382   :  { %v629_v7 = vsub.f32 %v593_v39, %v621_v6  ;;  %656 = vadd.xlane.f32.xlu1 %v655_v29  ;;  %v652_v8 = vsel %vm208_vm2, %v3477_v5, 0.0  ;;  %v618_v16 = vpop.xlane.xlu0 %617 }
 0x383   :  { %653 = vadd.xlane.f32.xlu0 %v652_v8  ;;  %v628_v18 = vsub.f32 %v3462_v38, %v618_v16 }
 0x384   :  { %v644_v9 = vmul.f32 1.442695, %v629_v7 }
 0x385   :  { %v642_v19 = vmul.f32 1.442695, %v628_v18  ;;  %v792_v23 = vpop.permute.xlu1 %791 }
 0x386   :  { %3100 = vpow2.f32 %v644_v9  ;;  %v840_v24 = vpop.permute.xlu0 %839  ;;  %v797_v39 = vsel %vm699_vm3, %v792_v23, 0 }
 0x387   :  { %3102 = vpow2.f32 %v638_v17  ;;  %v845_v38 = vsel %vm699_vm3, %v840_v24, 0 }
 0x388   :  { %v3483_v10 = vpop.eup %3098  ;;  %3104 = vpow2.f32 %v642_v19 }
 0x389   :  { %v661_v11 = vsel %vm208_vm2, %v3483_v10, 0.0 }
 0x38a   :  { %662 = vadd.xlane.f32.xlu1 %v661_v11 }
 0x390   :  { %v3487_v12 = vpop.eup %3100 }
 0x391   :  { %v667_v13 = vsel %vm208_vm2, %v3487_v12, 0.0  ;;  %v3497_v25 = vpop.eup %3102 }
 0x392   :  { %668 = vadd.xlane.f32.xlu1 %v667_v13  ;;  %v3501_v22 = vpop.eup %3104 }
 0x399   :  { %935 = vrot.lane.b32.xlu0 %v3385_v28, %s3273_s8  ;;  %v658_v28 = vsel %vm208_vm2, %v3497_v25, 0.0 }
 0x3a3   :  { %983 = vrot.lane.b32.xlu1 %v3395_v33, %s3273_s8  ;;  %v664_v33 = vsel %vm208_vm2, %v3501_v22, 0.0 }
 0x3b6   :  { %v651_v26 = vpop.xlane.xlu1 %650  ;;  %v648_v27 = vpop.xlane.xlu0 %647 }
 0x3b7   :  { %3106 = vrcp.f32 %v651_v26 }
 0x3b8   :  { %3108 = vrcp.f32 %v648_v27  ;;  %659 = vadd.xlane.f32.xlu0 %v658_v28 }
 0x3ba   :  { %v888_v40 = vpop.permute.xlu1 %887 }
 0x3bc   :  { %665 = vadd.xlane.f32.xlu0 %v664_v33 }
 0x3c1   :  { %v3107_v30 = vpop.eup %3106 }
 0x3c2   :  { %v3109_v31 = vpop.eup %3108  ;;  %v679_v32 = vmul.f32 %v3107_v30, %v3093_v55  ;;  %v3076_v30 = vld [vmem:[#allocation7 + $0x4] ss:$28 sps:$4 sm:$0xff]  }
 0x3c3   :  { %v678_v35 = vmul.f32 %v3109_v31, %v3091_v54 }
 0x3c4   :  { %v687_v36 = vpack.c.bf16 %v679_v32, %v679_v32 }
 0x3c5   :  { %v686_v37 = vpack.c.bf16 %v678_v35, %v678_v35 }
 0x3c6   :  { %2795 = vmatmul.mubr.msk.bf16.vlgmr.msra.gmra.mrb[16].mxu0 %vm208_vm2, %v687_v36  ;;  %v3077_v36 = vld [vmem:[#allocation7 + $0x3c] ss:$28 sps:$4 sm:$0xff]  }
 0x3c7   :  { %2789 = vmatmul.mubr.msk.bf16.vlgmr.msra.gmra.mrb[20].mxu1 %vm208_vm2, %v686_v37  ;;  %2805 = vmatpush3.bf16.msra.mxu0 %v845_v38 }
 0x3c8   :  { %2799 = vmatpush3.bf16.msra.mxu1 %v797_v39  ;;  %2800 = vmatprep.mubr.msk.bf16.mxu1 %vm3268_vm0, %v3267_v0 }
 0x3c9   :  { %2806 = vmatprep.mubr.msk.bf16.mxu0 %vm3268_vm0, %v3267_v0  ;;  %2810 = vmatprep.subr.bf16.mxu1 %v3267_v0 }
 0x3ca   :  { %2816 = vmatprep.subr.bf16.mxu0 %v3267_v0 }
 0x3d2   :  { %1031 = vrot.lane.b32.xlu0 %v3398_v34, %s3273_s8  ;;  %v893_v34 = vsel %vm699_vm3, %v888_v40, 0  ;;  %s3276_s8 = smov [#allocation8]  }
 0x40f   :  { %v657_v41 = vpop.xlane.xlu1 %656 }
 0x410   :  { %3110 = vrcp.f32 %v657_v41  ;;  %v654_v42 = vpop.xlane.xlu0 %653 }
 0x411   :  { %3112 = vrcp.f32 %v654_v42 }
 0x414   :  { %v936_v48 = vpop.permute.xlu0 %935 }
 0x415   :  { %v941_v51 = vsel %vm699_vm3, %v936_v48, 0 }
 0x417   :  { %v663_v43 = vpop.xlane.xlu1 %662 }
 0x418   :  { %3114 = vrcp.f32 %v663_v43 }
 0x41a   :  { %v3111_v44 = vpop.eup %3110 }
 0x41b   :  { %v3113_v45 = vpop.eup %3112  ;;  %v681_v46 = vmul.f32 %v3111_v44, %v3475_v2 }
 0x41c   :  { %v680_v47 = vmul.f32 %v3113_v45, %v3477_v5 }
 0x41d   :  { %v689_v49 = vpack.c.bf16 %v681_v46, %v681_v46 }
 0x41e   :  { %v688_v50 = vpack.c.bf16 %v680_v47, %v680_v47 }
 0x41f   :  { %2807 = vmatmul.mubr.msk.bf16.vlgmr.msra.gmra.mrb[20].mxu0 %vm208_vm2, %v689_v49  ;;  %v669_v55 = vpop.xlane.xlu1 %668 }
 0x420   :  { %2801 = vmatmul.mubr.msk.bf16.vlgmr.msra.gmra.mrb[24].mxu1 %vm208_vm2, %v688_v50  ;;  %2817 = vmatpush3.bf16.msra.mxu0 %v941_v51  ;;  %3116 = vrcp.f32 %v669_v55 }
 0x421   :  { %2811 = vmatpush3.bf16.msra.mxu1 %v893_v34  ;;  %2818 = vmatprep.mubr.msk.bf16.mxu0 %vm3268_vm0, %v3267_v0 }
 0x422   :  { %v3115_v52 = vpop.eup %3114  ;;  %2828 = vmatprep.subr.bf16.mxu0 %v3267_v0  ;;  %2812 = vmatprep.mubr.msk.bf16.mxu1 %vm3268_vm0, %v3267_v0 }
 0x423   :  { %v683_v53 = vmul.f32 %v3115_v52, %v3483_v10  ;;  %2822 = vmatprep.subr.bf16.mxu1 %v3267_v0  ;;  %v984_v63 = vpop.permute.xlu1 %983 }
 0x424   :  { %v989_v5 = vsel %vm699_vm3, %v984_v63, 0 }
 0x425   :  { %v691_v54 = vpack.c.bf16 %v683_v53, %v683_v53 }
 0x427   :  { %2819 = vmatmul.mubr.msk.bf16.vlgmr.msra.gmra.mrb[24].mxu0 %vm208_vm2, %v691_v54 }
 0x428   :  { %2830 = vmatprep.mubr.msk.bf16.mxu0 %vm3268_vm0, %v3267_v0 }
 0x42a   :  { %v3117_v58 = vpop.eup %3116 }
 0x42b   :  { %v685_v21 = vmul.f32 %v3117_v58, %v3487_v12 }
 0x42d   :  { %v693_v61 = vpack.c.bf16 %v685_v21, %v685_v21 }
 0x445   :  { %v660_v57 = vpop.xlane.xlu0 %659 }
 0x446   :  { %3118 = vrcp.f32 %v660_v57 }
 0x449   :  { %v666_v20 = vpop.xlane.xlu0 %665 }
 0x44a   :  { %3120 = vrcp.f32 %v666_v20 }
 0x44d   :  { %v1032_v59 = vpop.permute.xlu0 %1031 }
 0x44e   :  { %v1037_v56 = vsel %vm699_vm3, %v1032_v59, 0 }
 0x44f   :  { %2829 = vmatpush3.bf16.msra.mxu0 %v1037_v56 }
 0x450   :  { %v3119_v60 = vpop.eup %3118  ;;  %2842 = vmatprep.subr.bf16.mxu0 %v3267_v0 }
 0x451   :  { %v682_v62 = vmul.f32 %v3119_v60, %v3497_v25 }
 0x452   :  { %2831 = vmatmul.mubr.msk.bf16.vlgmr.msra.gmra.mrb[28].mxu0 %vm208_vm2, %v693_v61  ;;  %v2595_v61 = vld [vmem:[%s3844_s3 + $0x1] ss:$0 sm:$0xff] }
 0x453   :  { %v690_v1 = vpack.c.bf16 %v682_v62, %v682_v62  ;;  %2846 = vmatprep.mubr.msk.bf16.mxu0 %vm3268_vm0, %v3267_v0 }
 0x454   :  { %v3121_v2 = vpop.eup %3120 }
 0x455   :  { %2813 = vmatmul.mubr.msk.bf16.vlgmr.msra.gmra.mrb[28].mxu1 %vm208_vm2, %v690_v1  ;;  %v684_v6 = vmul.f32 %v3121_v2, %v3501_v22 }
 0x456   :  { %2823 = vmatpush3.bf16.msra.mxu1 %v989_v5  ;;  %2824 = vmatprep.mubr.msk.bf16.mxu1 %vm3268_vm0, %v3267_v0 }
 0x457   :  { %2834 = vmatprep.subr.bf16.mxu1 %v3267_v0  ;;  %v692_v29 = vpack.c.bf16 %v684_v6, %v684_v6 }
 0x45d   :  { %2825 = vmatmul.mubr.msk.bf16.vlgmr.msra.gmra.mrb[32].mxu1 %vm208_vm2, %v692_v29 }
 0x45e   :  { %2838 = vmatprep.mubr.msk.bf16.mxu1 %vm3268_vm0, %v3267_v0  ;;  %2835 = vmatpush3.bf16.msra.mxu1 %v3076_v30 }
 0x45f   :  { %2836 = vmatprep.subr.bf16.mxu1 %v3267_v0 }
 0x462   :  { %2837 = vmatpush3.bf16.msra.mxu1 %v3077_v36 }
 0x463   :  { %2850 = vmatprep.subr.bf16.mxu1 %v3267_v0 }
 0x499   :  { %v785_v7 = vpop.f32.mrb[16].mxu0 }
 0x49a   :  { %v737_v8 = vpop.f32.mrb[20].mxu1  ;;  %v2796_v9 = vpop.f32.mrb[17].mxu0 }
 0x49b   :  { %v2790_v10 = vpop.f32.mrb[21].mxu1  ;;  %v788_v11 = vpop.f32.mrb[18].mxu0 }
 0x49c   :  { %v740_v12 = vpop.f32.mrb[22].mxu1  ;;  %v2797_v13 = vpop.f32.mrb[19].mxu0 }
 0x49d   :  { %v2791_v14 = vpop.f32.mrb[23].mxu1 }
 0x4f2   :  { %v881_v15 = vpop.f32.mrb[20].mxu0 }
 0x4f3   :  { %v833_v16 = vpop.f32.mrb[24].mxu1  ;;  %v2808_v17 = vpop.f32.mrb[21].mxu0 }
 0x4f4   :  { %v3014_v18 = vpack.i.bf16 %v881_v15, %v833_v16  ;;  %v2802_v19 = vpop.f32.mrb[25].mxu1  ;;  %v884_v23 = vpop.f32.mrb[22].mxu0 }
 0x4f5   :  { %v836_v24 = vpop.f32.mrb[26].mxu1  ;;  %v2809_v25 = vpop.f32.mrb[23].mxu0  ;;  %v3078_v19 = vld [vmem:[#allocation7 + $0xc] ss:$28 sps:$4 sm:$0xff]   ;;  %v62_v23 = vld [vmem:[#allocation5] sm:$0xff] }
 0x4f6   :  { %3015 = vrot.lane.b32.xlu1 %v3014_v18, %s3263_s28  ;;  %v2803_v26 = vpop.f32.mrb[27].mxu1  ;;  %v63_v24 = vld [vmem:[#allocation5 + $0x8] sm:$0xff] }
 0x4f7   :  { %v1274_v25 = vpack.c.bf16 %v63_v24, %v62_v23  ;;  %v3080_v26 = vld [vmem:[#allocation7 + $0x8] ss:$28 sps:$4 sm:$0xff]  }
 0x4f8   :  { %2843 = vmatpush3.bf16.msra.mxu0 %v3080_v26 }
 0x4f9   :  { %2844 = vmatprep.subr.bf16.mxu0 %v3267_v0 }
 0x4fa   :  { %v977_v27 = vpop.f32.mrb[24].mxu0 }
 0x4fb   :  { %v2820_v28 = vpop.f32.mrb[25].mxu0 }
 0x4fc   :  { %v980_v22 = vpop.f32.mrb[26].mxu0 }
 0x4fd   :  { %v2821_v33 = vpop.f32.mrb[27].mxu0 }
 0x525   :  { %v1073_v31 = vpop.f32.mrb[28].mxu0 }
 0x526   :  { %v2832_v32 = vpop.f32.mrb[29].mxu0 }
 0x527   :  { %v1076_v35 = vpop.f32.mrb[30].mxu0 }
 0x528   :  { %v929_v37 = vpop.f32.mrb[28].mxu1  ;;  %v2833_v38 = vpop.f32.mrb[31].mxu0 }
 0x529   :  { %v3019_v39 = vpack.i.bf16 %v977_v27, %v929_v37  ;;  %v2814_v40 = vpop.f32.mrb[29].mxu1  ;;  %v3081_v27 = vld [vmem:[#allocation7 + $0x40] ss:$28 sps:$4 sm:$0xff]   ;;  %v2599_v37 = vld [vmem:[%s3844_s3 + $0x8] ss:$0 sm:$0xff] }
 0x52a   :  { %v932_v41 = vpop.f32.mrb[30].mxu1  ;;  %2845 = vmatpush3.bf16.msra.mxu0 %v3081_v27 }
 0x52b   :  { %3020 = vrot.lane.b32.xlu0 %v3019_v39, %s3274_s9  ;;  %v2815_v42 = vpop.f32.mrb[31].mxu1  ;;  %2858 = vmatprep.subr.bf16.mxu0 %v3267_v0  ;;  %v2600_v41 = vld [vmem:[%s3844_s3 + $0x9] ss:$0 sm:$0xff] }
 0x530   :  { %v1025_v43 = vpop.f32.mrb[32].mxu1 }
 0x531   :  { %v3024_v44 = vpack.i.bf16 %v1073_v31, %v1025_v43  ;;  %v2826_v45 = vpop.f32.mrb[33].mxu1 }
 0x532   :  { %v1028_v46 = vpop.f32.mrb[34].mxu1 }
 0x533   :  { %3025 = vrot.lane.b32.xlu1 %v3024_v44, %s3275_s10  ;;  %v2827_v47 = vpop.f32.mrb[35].mxu1  ;;  %v2605_v46 = vld [vmem:[%s3844_s3 + $0x3] ss:$0 sm:$0xff] }
 0x568   :  { %v3016_v48 = vpop.permute.xlu1 %3015 }
 0x569   :  { %v3018_v50 = vunpack.i.h.bf16 %v3016_v48  ;;  %v3017_v51 = vunpack.i.l.bf16 %v3016_v48 }
 0x56b   :  { %v1104_v54 = vsel %vm208_vm2, %v785_v7, %v3018_v50  ;;  %v1103_v55 = vsel %vm208_vm2, %v737_v8, %v3017_v51 }
 0x59d   :  { %v3021_v49 = vpop.permute.xlu0 %3020 }
 0x59e   :  { %v3023_v34 = vunpack.i.h.bf16 %v3021_v49  ;;  %v3022_v52 = vunpack.i.l.bf16 %v3021_v49 }
 0x5a0   :  { %v1107_v20 = vsel %vm1105_vm5, %v1104_v54, %v3023_v34  ;;  %v1106_v21 = vsel %vm1105_vm5, %v1103_v55, %v3022_v52 }
 0x5a5   :  { %v3026_v53 = vpop.permute.xlu1 %3025 }
 0x5a6   :  { %v3028_v57 = vunpack.i.h.bf16 %v3026_v53  ;;  %v3027_v58 = vunpack.i.l.bf16 %v3026_v53 }
 0x5a8   :  { %v1110_v59 = vsel %vm1108_vm6, %v1107_v20, %v3028_v57  ;;  %v1109_v56 = vsel %vm1108_vm6, %v1106_v21, %v3027_v58  ;;  %v2601_v21 = vld [vmem:[%s3844_s3 + $0x2] ss:$0 sm:$0xff] }
 0x5a9   :  { %v1111_v60 = vpack.c.bf16 %v1110_v59, %v1109_v56 }
 0x5ab   :  { %2839 = vmatmul.mubr.msk.bf16.vlgmr.msra.gmra.mrb[36].mxu1 %vm132_vm1, %v1111_v60 }
 0x5ac   :  { %2854 = vmatprep.mubr.msk.bf16.mxu1 %vm3268_vm0, %v3267_v0  ;;  %2851 = vmatpush3.bf16.msra.mxu1 %v3078_v19 }
 0x5ad   :  { %2852 = vmatprep.subr.bf16.mxu1 %v3267_v0 }
 0x67e   :  { %v1165_v62 = vpop.f32.mrb[36].mxu1 }
 0x67f   :  { %v1166_v63 = vadd.f32 %v2595_v61, %v1165_v62  ;;  %v2840_v1 = vpop.f32.mrb[37].mxu1 }
 0x680   :  { %v1168_v2 = vpop.f32.mrb[38].mxu1 }
 0x681   :  { %v1169_v5 = vadd.f32 %v2595_v61, %v1168_v2  ;;  %v2841_v6 = vpop.f32.mrb[39].mxu1  ;;  %v1172_v29 = vadd.f32 %v1166_v63, %v3357_v3 }
 0x683   :  { %v1174_v7 = vsel %vm132_vm1, %v1172_v29, 0.0  ;;  %v1173_v8 = vadd.f32 %v1169_v5, %v3359_v4  ;;  %v3079_v4 = vld [vmem:[#allocation7 + $0x44] ss:$28 sps:$4 sm:$0xff]  }
 0x684   :  { %1175 = vadd.xlane.f32.xlu0 %v1174_v7  ;;  %2853 = vmatpush3.bf16.msra.mxu1 %v3079_v4 }
 0x685   :  { %v1177_v9 = vsel %vm132_vm1, %v1173_v8, 0.0  ;;  %2864 = vmatprep.subr.bf16.mxu1 %v3267_v0 }
 0x686   :  { %1178 = vadd.xlane.f32.xlu1 %v1177_v9 }
 0x687   :  { %2855 = vmatmul.mubr.msk.bf16.vlgmr.msra.gmra.mrb[40].mxu1 %vm132_vm1, %v1274_v25 }
 0x688   :  { %2866 = vmatprep.mubr.msk.bf16.mxu1 %vm3268_vm0, %v3267_v0 }
 0x711   :  { %v1176_v10 = vpop.xlane.xlu0 %1175 }
 0x712   :  { %v1181_v11 = vmul.f32 0.03125, %v1176_v10 }
 0x713   :  { %v1179_v12 = vpop.xlane.xlu1 %1178 }
 0x714   :  { %v1183_v13 = vsub.f32 %v1172_v29, %v1181_v11  ;;  %v1182_v14 = vmul.f32 0.03125, %v1179_v12 }
 0x716   :  { %v1184_v15 = vsub.f32 %v1173_v8, %v1182_v14  ;;  %v1185_v16 = vmul.f32 %v1183_v13, %v1183_v13 }
 0x718   :  { %v1187_v17 = vsel %vm132_vm1, %v1185_v16, 0.0  ;;  %v1186_v18 = vmul.f32 %v1184_v15, %v1184_v15 }
 0x719   :  { %1188 = vadd.xlane.f32.xlu0 %v1187_v17 }
 0x71a   :  { %v1190_v3 = vsel %vm132_vm1, %v1186_v18, 0.0 }
 0x71d   :  { %1191 = vadd.xlane.f32.xlu0 %v1190_v3 }
 0x75a   :  { %v1328_v47 = vpop.f32.mrb[40].mxu1 }
 0x75b   :  { %v1329_v48 = vadd.f32 %v2605_v46, %v1328_v47  ;;  %v2856_v49 = vpop.f32.mrb[41].mxu1 }
 0x75c   :  { %v1331_v50 = vpop.f32.mrb[42].mxu1 }
 0x75d   :  { %v1332_v51 = vadd.f32 %v2605_v46, %v1331_v50  ;;  %v2857_v34 = vpop.f32.mrb[43].mxu1  ;;  %v1383_v52 = vpack.c.bf16 %v1329_v48, %v1329_v48 }
 0x75f   :  { %v3029_v53 = vpack.i.bf16 %v1332_v51, %v1329_v48  ;;  %v1395_v54 = vsel %vm208_vm2, %v1383_v52, 0  ;;  %v3598_v55 = vpack.c.bf16 %v1332_v51, %v1332_v51 }
 0x761   :  { %3030 = vrot.lane.b32.xlu1 %v3029_v53, %s3270_s5  ;;  %v1441_v57 = vsel %vm208_vm2, %v3598_v55, 0 }
 0x762   :  { %2865 = vmatpush3.bf16.xpose.msra.mxu1 %v1441_v57 }
 0x763   :  { %2876 = vmatprep.subr.bf16.mxu1 %v3267_v0 }
 0x765   :  { %3040 = vrot.lane.b32.xlu1 %v3029_v53, %s3272_s7 }
 0x7a6   :  { %v1189_v28 = vpop.xlane.xlu0 %1188 }
 0x7a7   :  { %v1193_v22 = vmul.f32 0.03125, %v1189_v28 }
 0x7a9   :  { %v1195_v33 = vadd.f32 1e-05, %v1193_v22 }
 0x7aa   :  { %v1192_v30 = vpop.xlane.xlu0 %1191 }
 0x7ab   :  { %3122 = vrsqrt.f32 %v1195_v33  ;;  %v1194_v31 = vmul.f32 0.03125, %v1192_v30 }
 0x7ad   :  { %v1196_v32 = vadd.f32 1e-05, %v1194_v31 }
 0x7af   :  { %3124 = vrsqrt.f32 %v1196_v32 }
 0x7b5   :  { %v3123_v35 = vpop.eup %3122 }
 0x7b6   :  { %v1199_v36 = vmul.f32 %v3123_v35, %v1183_v13 }
 0x7b8   :  { %v1205_v39 = vmul.f32 %v2599_v37, %v1199_v36 }
 0x7b9   :  { %v3125_v38 = vpop.eup %3124 }
 0x7ba   :  { %v1200_v40 = vmul.f32 %v3125_v38, %v1184_v15  ;;  %v3585_v43 = vadd.f32 %v2600_v41, %v1205_v39 }
 0x7bc   :  { %v1206_v42 = vmul.f32 %v2599_v37, %v1200_v40 }
 0x7be   :  { %v3587_v44 = vadd.f32 %v2600_v41, %v1206_v42 }
 0x7c0   :  { %v1213_v45 = vpack.c.bf16 %v3587_v44, %v3585_v43 }
 0x7c2   :  { %2847 = vmatmul.mubr.msk.bf16.vlgmr.msra.gmra.mrb[32].mxu0 %vm132_vm1, %v1213_v45 }
 0x7c3   :  { %2860 = vmatprep.mubr.msk.bf16.mxu0 %vm3268_vm0, %v3267_v0  ;;  %2859 = vmatpush3.bf16.xpose.msra.mxu0 %v1395_v54 }
 0x7c4   :  { %2870 = vmatprep.subr.bf16.mxu0 %v3267_v0 }
 0x7d3   :  { %v3031_v58 = vpop.permute.xlu1 %3030 }
 0x7d4   :  { %v3032_v20 = vunpack.i.l.bf16 %v3031_v58  ;;  %v3033_v59 = vunpack.i.h.bf16 %v3031_v58 }
 0x7d6   :  { %v3609_v56 = vpack.c.bf16 %v3032_v20, %v3032_v20  ;;  %v3611_v1 = vpack.c.bf16 %v3033_v59, %v3033_v59 }
 0x7d7   :  { %v3041_v10 = vpop.permute.xlu1 %3040 }
 0x7d8   :  { %v1487_v29 = vsel %vm208_vm2, %v3609_v56, 0  ;;  %v1533_v9 = vsel %vm208_vm2, %v3611_v1, 0  ;;  %v3043_v11 = vunpack.i.h.bf16 %v3041_v10  ;;  %v3042_v12 = vunpack.i.l.bf16 %v3041_v10 }
 0x7da   :  { %v3630_v14 = vpack.c.bf16 %v3043_v11, %v3043_v11  ;;  %v3632_v15 = vpack.c.bf16 %v3042_v12, %v3042_v12 }
 0x7dc   :  { %v1579_v25 = vsel %vm208_vm2, %v3632_v15, 0  ;;  %v1625_v26 = vsel %vm208_vm2, %v3630_v14, 0 }
 0x895   :  { %v1267_v60 = vpop.f32.mrb[32].mxu0 }
 0x896   :  { %v1268_v61 = vadd.f32 %v2601_v21, %v1267_v60  ;;  %v2848_v62 = vpop.f32.mrb[33].mxu0 }
 0x897   :  { %v1270_v63 = vpop.f32.mrb[34].mxu0 }
 0x898   :  { %v1375_v2 = vpack.c.bf16 %v1268_v61, %v1268_v61  ;;  %v1271_v5 = vadd.f32 %v2601_v21, %v1270_v63  ;;  %v2849_v6 = vpop.f32.mrb[35].mxu0 }
 0x89a   :  { %v1376_v7 = vpack.c.bf16 %v1271_v5, %v1271_v5  ;;  %2861 = vmatmul.mubr.msk.bf16.vlgmr.msra.gmra.mrb[36].mxu0 %vm208_vm2, %v1375_v2  ;;  %v3034_v8 = vpack.i.bf16 %v1271_v5, %v1268_v61 }
 0x89b   :  { %2871 = vmatpush3.bf16.xpose.msra.mxu0 %v1487_v29  ;;  %2872 = vmatprep.mubr.msk.bf16.mxu0 %vm3268_vm0, %v3267_v0 }
 0x89c   :  { %3035 = vrot.lane.b32.xlu0 %v3034_v8, %s3270_s5  ;;  %3045 = vrot.lane.b32.xlu1 %v3034_v8, %s3272_s7 }
 0x89d   :  { %2867 = vmatmul.mubr.msk.bf16.vlgmr.msra.gmra.mrb[44].mxu1 %vm208_vm2, %v1376_v7  ;;  %2882 = vmatprep.subr.bf16.mxu0 %v3267_v0 }
 0x89e   :  { %2877 = vmatpush3.bf16.xpose.msra.mxu1 %v1533_v9  ;;  %2878 = vmatprep.mubr.msk.bf16.mxu1 %vm3268_vm0, %v3267_v0 }
 0x89f   :  { %2888 = vmatprep.subr.bf16.mxu1 %v3267_v0 }
 0x8a0   :  { %3050 = vrot.lane.b32.xlu0 %v3029_v53, %s3269_s30  ;;  %3055 = vrot.lane.b32.xlu1 %v3034_v8, %s3269_s30 }
 0x8a4   :  { %1856 = vrot.lane.b32.xlu1 %v1383_v52, %s3271_s6 }
 0x90e   :  { %v3036_v13 = vpop.permute.xlu0 %3035  ;;  %v3046_v19 = vpop.permute.xlu1 %3045 }
 0x90f   :  { %v3038_v16 = vunpack.i.h.bf16 %v3036_v13  ;;  %v3037_v17 = vunpack.i.l.bf16 %v3036_v13  ;;  %v3048_v27 = vunpack.i.h.bf16 %v3046_v19  ;;  %v3047_v28 = vunpack.i.l.bf16 %v3046_v19 }
 0x911   :  { %v1378_v18 = vpack.c.bf16 %v3038_v16, %v3038_v16  ;;  %v1377_v3 = vpack.c.bf16 %v3037_v17, %v3037_v17  ;;  %v1380_v30 = vpack.c.bf16 %v3048_v27, %v3048_v27  ;;  %v1379_v31 = vpack.c.bf16 %v3047_v28, %v3047_v28 }
 0x912   :  { %v3051_v4 = vpop.permute.xlu0 %3050  ;;  %v3056_v32 = vpop.permute.xlu1 %3055 }
 0x913   :  { %v3053_v23 = vunpack.i.h.bf16 %v3051_v4  ;;  %v3052_v24 = vunpack.i.l.bf16 %v3051_v4  ;;  %2873 = vmatmul.mubr.msk.bf16.vlgmr.msra.gmra.mrb[40].mxu0 %vm208_vm2, %v1377_v3  ;;  %2879 = vmatmul.mubr.msk.bf16.vlgmr.msra.gmra.mrb[48].mxu1 %vm208_vm2, %v1378_v18  ;;  %v3058_v37 = vunpack.i.h.bf16 %v3056_v32  ;;  %v3057_v38 = vunpack.i.l.bf16 %v3056_v32 }
 0x914   :  { %2883 = vmatpush3.bf16.xpose.msra.mxu0 %v1579_v25  ;;  %2889 = vmatpush3.bf16.xpose.msra.mxu1 %v1625_v26 }
 0x915   :  { %2884 = vmatprep.mubr.msk.bf16.mxu0 %vm3268_vm0, %v3267_v0  ;;  %2890 = vmatprep.mubr.msk.bf16.mxu1 %vm3268_vm0, %v3267_v0  ;;  %v3645_v22 = vpack.c.bf16 %v3053_v23, %v3053_v23  ;;  %v3647_v33 = vpack.c.bf16 %v3052_v24, %v3052_v24  ;;  %v1382_v40 = vpack.c.bf16 %v3058_v37, %v3058_v37 }
 0x916   :  { %2894 = vmatprep.subr.bf16.mxu0 %v3267_v0  ;;  %2900 = vmatprep.subr.bf16.mxu1 %v3267_v0  ;;  %v1857_v39 = vpop.permute.xlu1 %1856  ;;  %v1381_v41 = vpack.c.bf16 %v3057_v38, %v3057_v38 }
 0x917   :  { %v1671_v35 = vsel %vm208_vm2, %v3647_v33, 0  ;;  %v1717_v36 = vsel %vm208_vm2, %v3645_v22, 0  ;;  %v1862_v42 = vsel %vm699_vm3, %v1857_v39, 0 }
 0x91b   :  { %2885 = vmatmul.mubr.msk.bf16.vlgmr.msra.gmra.mrb[44].mxu0 %vm208_vm2, %v1379_v31  ;;  %2891 = vmatmul.mubr.msk.bf16.vlgmr.msra.gmra.mrb[52].mxu1 %vm208_vm2, %v1380_v30 }
 0x91c   :  { %2895 = vmatpush3.bf16.xpose.msra.mxu0 %v1671_v35  ;;  %2901 = vmatpush3.bf16.xpose.msra.mxu1 %v1717_v36 }
 0x91d   :  { %2896 = vmatprep.mubr.msk.bf16.mxu0 %vm3268_vm0, %v3267_v0  ;;  %2902 = vmatprep.mubr.msk.bf16.mxu1 %vm3268_vm0, %v3267_v0 }
 0x91e   :  { %2906 = vmatprep.subr.bf16.mxu0 %v3267_v0  ;;  %2912 = vmatprep.subr.bf16.mxu1 %v3267_v0 }
 0x923   :  { %2897 = vmatmul.mubr.msk.bf16.vlgmr.msra.gmra.mrb[48].mxu0 %vm208_vm2, %v1381_v41  ;;  %2903 = vmatmul.mubr.msk.bf16.vlgmr.msra.gmra.mrb[56].mxu1 %vm208_vm2, %v1382_v40 }
 0x924   :  { %2907 = vmatpush3.bf16.msra.mxu0 %v1862_v42  ;;  %2914 = vmatprep.mubr.msk.bf16.mxu1 %vm3268_vm0, %v3267_v0 }
 0x925   :  { %2908 = vmatprep.mubr.msk.bf16.mxu0 %vm3268_vm0, %v3267_v0  ;;  %2918 = vmatprep.subr.bf16.mxu0 %v3267_v0 }
 0x96d   :  { %v1431_v45 = vpop.f32.mrb[36].mxu0 }
 0x96e   :  { %v2862_v46 = vpop.f32.mrb[37].mxu0  ;;  %v1759_v47 = vsel %vm208_vm2, %v1431_v45, -inf }
 0x96f   :  { %v1434_v48 = vpop.f32.mrb[38].mxu0  ;;  %1760 = vmax.xlane.f32.xlu0 %v1759_v47 }
 0x970   :  { %v1477_v49 = vpop.f32.mrb[44].mxu1  ;;  %v2863_v50 = vpop.f32.mrb[39].mxu0 }
 0x971   :  { %v2868_v51 = vpop.f32.mrb[45].mxu1  ;;  %v1762_v34 = vsel %vm208_vm2, %v1477_v49, -inf }
 0x972   :  { %1763 = vmax.xlane.f32.xlu1 %v1762_v34  ;;  %v1480_v52 = vpop.f32.mrb[46].mxu1 }
 0x973   :  { %v2869_v53 = vpop.f32.mrb[47].mxu1 }
 0x9e6   :  { %v1523_v54 = vpop.f32.mrb[40].mxu0  ;;  %v1569_v57 = vpop.f32.mrb[48].mxu1 }
 0x9e7   :  { %v2874_v58 = vpop.f32.mrb[41].mxu0  ;;  %v2880_v20 = vpop.f32.mrb[49].mxu1  ;;  %v1765_v21 = vsel %vm208_vm2, %v1523_v54, -inf  ;;  %v1768_v63 = vsel %vm208_vm2, %v1569_v57, -inf }
 0x9e8   :  { %1766 = vmax.xlane.f32.xlu0 %v1765_v21  ;;  %v1526_v59 = vpop.f32.mrb[42].mxu0  ;;  %v1572_v60 = vpop.f32.mrb[50].mxu1 }
 0x9e9   :  { %v2875_v61 = vpop.f32.mrb[43].mxu0  ;;  %v2881_v62 = vpop.f32.mrb[51].mxu1 }
 0x9ec   :  { %1769 = vmax.xlane.f32.xlu0 %v1768_v63 }
 0x9ee   :  { %v3674_v2 = vpop.f32.mrb[44].mxu0  ;;  %v3676_v5 = vpop.f32.mrb[52].mxu1 }
 0x9ef   :  { %v2886_v6 = vpop.f32.mrb[45].mxu0  ;;  %v2892_v29 = vpop.f32.mrb[53].mxu1  ;;  %v1771_v7 = vsel %vm208_vm2, %v3674_v2, -inf  ;;  %v1774_v8 = vsel %vm208_vm2, %v3676_v5, -inf }
 0x9f0   :  { %v1618_v9 = vpop.f32.mrb[46].mxu0  ;;  %1772 = vmax.xlane.f32.xlu1 %v1771_v7  ;;  %1775 = vmax.xlane.f32.xlu0 %v1774_v8  ;;  %v1664_v10 = vpop.f32.mrb[54].mxu1 }
 0x9f1   :  { %v2887_v11 = vpop.f32.mrb[47].mxu0  ;;  %v2893_v12 = vpop.f32.mrb[55].mxu1 }
 0x9f6   :  { %v1707_v13 = vpop.f32.mrb[48].mxu0  ;;  %v1753_v16 = vpop.f32.mrb[56].mxu1 }
 0x9f7   :  { %v2898_v17 = vpop.f32.mrb[49].mxu0  ;;  %v2904_v18 = vpop.f32.mrb[57].mxu1  ;;  %v1777_v3 = vsel %vm208_vm2, %v1707_v13, -inf  ;;  %v1780_v19 = vsel %vm208_vm2, %v1753_v16, -inf }
 0x9f8   :  { %v1710_v4 = vpop.f32.mrb[50].mxu0  ;;  %1778 = vmax.xlane.f32.xlu1 %v1777_v3  ;;  %1781 = vmax.xlane.f32.xlu0 %v1780_v19  ;;  %v1756_v23 = vpop.f32.mrb[58].mxu1 }
 0x9f9   :  { %v2899_v24 = vpop.f32.mrb[51].mxu0  ;;  %v2905_v25 = vpop.f32.mrb[59].mxu1 }
 0x9fc   :  { %v1761_v28 = vpop.xlane.xlu0 %1760 }
 0x9fd   :  { %v1783_v30 = vsub.f32 %v1431_v45, %v1761_v28 }
 0x9ff   :  { %v1764_v26 = vpop.xlane.xlu1 %1763  ;;  %v1791_v32 = vmul.f32 1.442695, %v1783_v30 }
 0xa00   :  { %v1784_v27 = vsub.f32 %v1477_v49, %v1764_v26 }
 0xa02   :  { %v1793_v31 = vmul.f32 1.442695, %v1784_v27 }
 0xa04   :  { %3126 = vpow2.f32 %v1793_v31 }
 0xa05   :  { %3128 = vpow2.f32 %v1791_v32 }
 0xa09   :  { %1954 = vrot.lane.b32.xlu1 %v3609_v56, %s3271_s6 }
 0xa0d   :  { %2003 = vrot.lane.b32.xlu1 %v3611_v1, %s3271_s6 }
 0xa0e   :  { %1905 = vrot.lane.b32.xlu0 %v3598_v55, %s3271_s6  ;;  %v3127_v35 = vpop.eup %3126 }
 0xa0f   :  { %v1810_v36 = vsel %vm208_vm2, %v3127_v35, 0.0  ;;  %v3691_v37 = vpop.eup %3128 }
 0xa10   :  { %v1807_v56 = vsel %vm208_vm2, %v3691_v37, 0.0 }
 0xa2d   :  { %1811 = vadd.xlane.f32.xlu0 %v1810_v36 }
 0xa31   :  { %1808 = vadd.xlane.f32.xlu1 %v1807_v56 }
 0xa75   :  { %v1767_v1 = vpop.xlane.xlu0 %1766 }
 0xa76   :  { %v1785_v55 = vsub.f32 %v1523_v54, %v1767_v1 }
 0xa78   :  { %v1795_v38 = vmul.f32 1.442695, %v1785_v55 }
 0xa79   :  { %v1770_v39 = vpop.xlane.xlu0 %1769 }
 0xa7a   :  { %3130 = vpow2.f32 %v1795_v38  ;;  %v1786_v40 = vsub.f32 %v1569_v57, %v1770_v39 }
 0xa7c   :  { %v1797_v41 = vmul.f32 1.442695, %v1786_v40 }
 0xa7d   :  { %v1776_v42 = vpop.xlane.xlu0 %1775  ;;  %v1773_v34 = vpop.xlane.xlu1 %1772 }
 0xa7e   :  { %3132 = vpow2.f32 %v1797_v41  ;;  %v1787_v52 = vsub.f32 %v3674_v2, %v1773_v34  ;;  %v1788_v54 = vsub.f32 %v3676_v5, %v1776_v42 }
 0xa80   :  { %v1799_v57 = vmul.f32 1.442695, %v1787_v52  ;;  %v1801_v20 = vmul.f32 1.442695, %v1788_v54 }
 0xa82   :  { %3134 = vpow2.f32 %v1799_v57 }
 0xa83   :  { %3136 = vpow2.f32 %v1801_v20 }
 0xa84   :  { %v3695_v45 = vpop.eup %3130 }
 0xa85   :  { %v1782_v46 = vpop.xlane.xlu0 %1781  ;;  %v1813_v47 = vsel %vm208_vm2, %v3695_v45, 0.0  ;;  %v1779_v53 = vpop.xlane.xlu1 %1778 }
 0xa86   :  { %1814 = vadd.xlane.f32.xlu1 %v1813_v47  ;;  %v1789_v58 = vsub.f32 %v1707_v13, %v1779_v53  ;;  %v1790_v59 = vsub.f32 %v1753_v16, %v1782_v46 }
 0xa88   :  { %v3699_v48 = vpop.eup %3132  ;;  %v1803_v21 = vmul.f32 1.442695, %v1789_v58  ;;  %v1805_v60 = vmul.f32 1.442695, %v1790_v59 }
 0xa89   :  { %v1906_v49 = vpop.permute.xlu0 %1905  ;;  %v1816_v50 = vsel %vm208_vm2, %v3699_v48, 0.0  ;;  %v1955_v61 = vpop.permute.xlu1 %1954 }
 0xa8a   :  { %v1911_v51 = vsel %vm699_vm3, %v1906_v49, 0  ;;  %1817 = vadd.xlane.f32.xlu0 %v1816_v50  ;;  %3138 = vpow2.f32 %v1803_v21  ;;  %v1960_v3 = vsel %vm699_vm3, %v1955_v61, 0 }
 0xa8b   :  { %2913 = vmatpush3.bf16.msra.mxu1 %v1911_v51  ;;  %3140 = vpow2.f32 %v1805_v60 }
 0xa8c   :  { %2924 = vmatprep.subr.bf16.mxu1 %v3267_v0 }
 0xa8d   :  { %v2004_v62 = vpop.permute.xlu1 %2003 }
 0xa8e   :  { %v2009_v16 = vsel %vm699_vm3, %v2004_v62, 0 }
 0xa97   :  { %2101 = vrot.lane.b32.xlu1 %v3630_v14, %s3271_s6  ;;  %v3711_v14 = vpop.eup %3134 }
 0xa98   :  { %v1819_v2 = vsel %vm208_vm2, %v3711_v14, 0.0 }
 0xaa0   :  { %2052 = vrot.lane.b32.xlu0 %v3632_v15, %s3271_s6  ;;  %v3713_v15 = vpop.eup %3136 }
 0xaa1   :  { %v3717_v5 = vpop.eup %3138  ;;  %v1822_v7 = vsel %vm208_vm2, %v3713_v15, 0.0 }
 0xaa2   :  { %v1825_v29 = vsel %vm208_vm2, %v3717_v5, 0.0  ;;  %v3723_v8 = vpop.eup %3140 }
 0xaa3   :  { %v1828_v9 = vsel %vm208_vm2, %v3723_v8, 0.0 }
 0xaba   :  { %v1812_v63 = vpop.xlane.xlu0 %1811 }
 0xabb   :  { %3142 = vrcp.f32 %v1812_v63  ;;  %1820 = vadd.xlane.f32.xlu1 %v1819_v2 }
 0xabe   :  { %v1809_v6 = vpop.xlane.xlu1 %1808 }
 0xabf   :  { %3144 = vrcp.f32 %v1809_v6  ;;  %1826 = vadd.xlane.f32.xlu1 %v1825_v29  ;;  %1823 = vadd.xlane.f32.xlu0 %v1822_v7  ;;  %v3082_v29 = vld [vmem:[#allocation7 + $0x10] ss:$28 sps:$4 sm:$0xff]  }
 0xac3   :  { %1829 = vadd.xlane.f32.xlu0 %v1828_v9 }
 0xac5   :  { %v3143_v10 = vpop.eup %3142 }
 0xac6   :  { %v1840_v11 = vmul.f32 %v3143_v10, %v3127_v35 }
 0xac8   :  { %v1848_v12 = vpack.c.bf16 %v1840_v11, %v1840_v11  ;;  %v3083_v11 = vld [vmem:[#allocation7 + $0x48] ss:$28 sps:$4 sm:$0xff]  }
 0xac9   :  { %v3145_v13 = vpop.eup %3144 }
 0xaca   :  { %v1839_v17 = vmul.f32 %v3145_v13, %v3691_v37  ;;  %2915 = vmatmul.mubr.msk.bf16.vlgmr.msra.gmra.mrb[60].mxu1 %vm208_vm2, %v1848_v12 }
 0xacb   :  { %2925 = vmatpush3.bf16.msra.mxu1 %v2009_v16  ;;  %2926 = vmatprep.mubr.msk.bf16.mxu1 %vm3268_vm0, %v3267_v0 }
 0xacc   :  { %v1847_v18 = vpack.c.bf16 %v1839_v17, %v1839_v17  ;;  %2936 = vmatprep.subr.bf16.mxu1 %v3267_v0 }
 0xace   :  { %2909 = vmatmul.mubr.msk.bf16.vlgmr.msra.gmra.mrb[52].mxu0 %vm208_vm2, %v1847_v18 }
 0xacf   :  { %2919 = vmatpush3.bf16.msra.mxu0 %v1960_v3  ;;  %2920 = vmatprep.mubr.msk.bf16.mxu0 %vm3268_vm0, %v3267_v0 }
 0xad0   :  { %2199 = vrot.lane.b32.xlu1 %v3645_v22, %s3271_s6  ;;  %2930 = vmatprep.subr.bf16.mxu0 %v3267_v0 }
 0xad9   :  { %2150 = vrot.lane.b32.xlu0 %v3647_v33, %s3271_s6 }
 0xb13   :  { %v1815_v19 = vpop.xlane.xlu1 %1814 }
 0xb14   :  { %3146 = vrcp.f32 %v1815_v19 }
 0xb17   :  { %v1818_v4 = vpop.xlane.xlu0 %1817  ;;  %v2102_v22 = vpop.permute.xlu1 %2101 }
 0xb18   :  { %3148 = vrcp.f32 %v1818_v4  ;;  %v2107_v31 = vsel %vm699_vm3, %v2102_v22, 0 }
 0xb1b   :  { %v2053_v25 = vpop.permute.xlu0 %2052 }
 0xb1c   :  { %v2058_v30 = vsel %vm699_vm3, %v2053_v25, 0 }
 0xb1e   :  { %v3147_v23 = vpop.eup %3146 }
 0xb1f   :  { %v1841_v24 = vmul.f32 %v3147_v23, %v3695_v45 }
 0xb21   :  { %v1849_v26 = vpack.c.bf16 %v1841_v24, %v1841_v24 }
 0xb22   :  { %v3149_v27 = vpop.eup %3148 }
 0xb23   :  { %v1842_v28 = vmul.f32 %v3149_v27, %v3699_v48  ;;  %2921 = vmatmul.mubr.msk.bf16.vlgmr.msra.gmra.mrb[56].mxu0 %vm208_vm2, %v1849_v26 }
 0xb24   :  { %2931 = vmatpush3.bf16.msra.mxu0 %v2058_v30  ;;  %2932 = vmatprep.mubr.msk.bf16.mxu0 %vm3268_vm0, %v3267_v0 }
 0xb25   :  { %v1850_v33 = vpack.c.bf16 %v1842_v28, %v1842_v28  ;;  %2942 = vmatprep.subr.bf16.mxu0 %v3267_v0 }
 0xb27   :  { %2927 = vmatmul.mubr.msk.bf16.vlgmr.msra.gmra.mrb[64].mxu1 %vm208_vm2, %v1850_v33 }
 0xb28   :  { %2937 = vmatpush3.bf16.msra.mxu1 %v2107_v31  ;;  %2938 = vmatprep.mubr.msk.bf16.mxu1 %vm3268_vm0, %v3267_v0 }
 0xb29   :  { %2948 = vmatprep.subr.bf16.mxu1 %v3267_v0 }
 0xb48   :  { %v1821_v32 = vpop.xlane.xlu1 %1820 }
 0xb49   :  { %3150 = vrcp.f32 %v1821_v32 }
 0xb4c   :  { %v1827_v35 = vpop.xlane.xlu1 %1826  ;;  %v1824_v36 = vpop.xlane.xlu0 %1823 }
 0xb4d   :  { %3152 = vrcp.f32 %v1827_v35 }
 0xb4e   :  { %3154 = vrcp.f32 %v1824_v36 }
 0xb50   :  { %v1830_v37 = vpop.xlane.xlu0 %1829  ;;  %v2200_v46 = vpop.permute.xlu1 %2199 }
 0xb51   :  { %3156 = vrcp.f32 %v1830_v37  ;;  %v2205_v49 = vsel %vm699_vm3, %v2200_v46, 0 }
 0xb53   :  { %v3151_v56 = vpop.eup %3150 }
 0xb54   :  { %v1843_v1 = vmul.f32 %v3151_v56, %v3711_v14  ;;  %v2151_v55 = vpop.permute.xlu0 %2150 }
 0xb55   :  { %v2156_v41 = vsel %vm699_vm3, %v2151_v55, 0 }
 0xb56   :  { %v1851_v38 = vpack.c.bf16 %v1843_v1, %v1843_v1 }
 0xb57   :  { %v3153_v39 = vpop.eup %3152 }
 0xb58   :  { %v3155_v40 = vpop.eup %3154  ;;  %2933 = vmatmul.mubr.msk.bf16.vlgmr.msra.gmra.mrb[60].mxu0 %vm208_vm2, %v1851_v38  ;;  %v1845_v45 = vmul.f32 %v3153_v39, %v3717_v5 }
 0xb59   :  { %v1844_v42 = vmul.f32 %v3155_v40, %v3713_v15  ;;  %2943 = vmatpush3.bf16.msra.mxu0 %v2156_v41  ;;  %2944 = vmatprep.mubr.msk.bf16.mxu0 %vm3268_vm0, %v3267_v0 }
 0xb5a   :  { %2954 = vmatprep.subr.bf16.mxu0 %v3267_v0  ;;  %v1853_v50 = vpack.c.bf16 %v1845_v45, %v1845_v45  ;;  %v2625_v45 = vld [vmem:[%s3844_s3 + $0x4] ss:$0 sm:$0xff] }
 0xb5b   :  { %v1852_v47 = vpack.c.bf16 %v1844_v42, %v1844_v42  ;;  %v3157_v48 = vpop.eup %3156 }
 0xb5c   :  { %v1846_v51 = vmul.f32 %v3157_v48, %v3723_v8 }
 0xb5d   :  { %2939 = vmatmul.mubr.msk.bf16.vlgmr.msra.gmra.mrb[68].mxu1 %vm208_vm2, %v1852_v47 }
 0xb5e   :  { %2949 = vmatpush3.bf16.msra.mxu1 %v2205_v49  ;;  %2950 = vmatprep.mubr.msk.bf16.mxu1 %vm3268_vm0, %v3267_v0  ;;  %v1854_v34 = vpack.c.bf16 %v1846_v51, %v1846_v51 }
 0xb5f   :  { %2962 = vmatprep.subr.bf16.mxu1 %v3267_v0 }
 0xb60   :  { %2945 = vmatmul.mubr.msk.bf16.vlgmr.msra.gmra.mrb[64].mxu0 %vm208_vm2, %v1853_v50 }
 0xb61   :  { %2958 = vmatprep.mubr.msk.bf16.mxu0 %vm3268_vm0, %v3267_v0  ;;  %2955 = vmatpush3.bf16.msra.mxu0 %v3082_v29 }
 0xb62   :  { %2956 = vmatprep.subr.bf16.mxu0 %v3267_v0 }
 0xb65   :  { %2951 = vmatmul.mubr.msk.bf16.vlgmr.msra.gmra.mrb[72].mxu1 %vm208_vm2, %v1854_v34  ;;  %2957 = vmatpush3.bf16.msra.mxu0 %v3083_v11  ;;  %v2629_v11 = vld [vmem:[%s3844_s3 + $0xa] ss:$0 sm:$0xff] }
 0xb66   :  { %2966 = vmatprep.mubr.msk.bf16.mxu1 %vm3268_vm0, %v3267_v0  ;;  %2970 = vmatprep.subr.bf16.mxu0 %v3267_v0 }
 0xb9d   :  { %v1947_v52 = vpop.f32.mrb[60].mxu1 }
 0xb9e   :  { %v2916_v53 = vpop.f32.mrb[61].mxu1 }
 0xb9f   :  { %v1950_v54 = vpop.f32.mrb[62].mxu1 }
 0xba0   :  { %v2917_v57 = vpop.f32.mrb[63].mxu1 }
 0xba1   :  { %v1898_v58 = vpop.f32.mrb[52].mxu0 }
 0xba2   :  { %v2910_v20 = vpop.f32.mrb[53].mxu0 }
 0xba3   :  { %v1901_v21 = vpop.f32.mrb[54].mxu0 }
 0xba4   :  { %v2911_v59 = vpop.f32.mrb[55].mxu0 }
 0xbf6   :  { %v1996_v60 = vpop.f32.mrb[56].mxu0 }
 0xbf7   :  { %v2922_v61 = vpop.f32.mrb[57].mxu0 }
 0xbf8   :  { %v1999_v14 = vpop.f32.mrb[58].mxu0 }
 0xbf9   :  { %v2923_v15 = vpop.f32.mrb[59].mxu0 }
 0xbfa   :  { %v2045_v62 = vpop.f32.mrb[64].mxu1 }
 0xbfb   :  { %v3059_v63 = vpack.i.bf16 %v2045_v62, %v1996_v60  ;;  %v2928_v2 = vpop.f32.mrb[65].mxu1  ;;  %v3084_v62 = vld [vmem:[#allocation7 + $0x14] ss:$28 sps:$4 sm:$0xff]  }
 0xbfc   :  { %v2048_v5 = vpop.f32.mrb[66].mxu1  ;;  %2963 = vmatpush3.bf16.msra.mxu1 %v3084_v62  ;;  %v3087_v2 = vld [vmem:[#allocation7 + $0x50] ss:$28 sps:$4 sm:$0xff]  }
 0xbfd   :  { %3060 = vrot.lane.b32.xlu0 %v3059_v63, %s3263_s28  ;;  %v2929_v6 = vpop.f32.mrb[67].mxu1  ;;  %2964 = vmatprep.subr.bf16.mxu1 %v3267_v0  ;;  %v3086_v63 = vld [vmem:[#allocation7 + $0x18] ss:$28 sps:$4 sm:$0xff]   ;;  %v2642_v62 = vld [vmem:[%s3844_s3 + $0xd] ss:$0 sm:$0xff] }
 0xc2b   :  { %v2094_v7 = vpop.f32.mrb[60].mxu0 }
 0xc2c   :  { %v2934_v8 = vpop.f32.mrb[61].mxu0 }
 0xc2d   :  { %v2097_v9 = vpop.f32.mrb[62].mxu0 }
 0xc2e   :  { %v2935_v10 = vpop.f32.mrb[63].mxu0 }
 0xc30   :  { %v2143_v12 = vpop.f32.mrb[68].mxu1 }
 0xc31   :  { %v3064_v13 = vpack.i.bf16 %v2143_v12, %v2094_v7  ;;  %v2940_v16 = vpop.f32.mrb[69].mxu1 }
 0xc32   :  { %v2146_v17 = vpop.f32.mrb[70].mxu1 }
 0xc33   :  { %3065 = vrot.lane.b32.xlu1 %v3064_v13, %s3274_s9  ;;  %v2941_v18 = vpop.f32.mrb[71].mxu1  ;;  %v2192_v3 = vpop.f32.mrb[64].mxu0  ;;  %s2562_s9 = sshll.u32 %s3276_s8, 4  ;;  %s2563_s9 = int_to_ptr.vmem [resolvable:$true] %s2562_s9 }
 0xc34   :  { %v2946_v19 = vpop.f32.mrb[65].mxu0  ;;  %v2630_v18 = vld [vmem:[%s3844_s3 + $0xb] ss:$0 sm:$0xff]  ;;  %p3237_p11 = scmp.lt.s32.totalorder %s2563_s9, %s2563_s9 }
 0xc35   :  { %v2195_v4 = vpop.f32.mrb[66].mxu0 }
 0xc36   :  { %v2947_v23 = vpop.f32.mrb[67].mxu0 }
 0xc38   :  { %v2241_v24 = vpop.f32.mrb[72].mxu1 }
 0xc39   :  { %v3069_v25 = vpack.i.bf16 %v2241_v24, %v2192_v3  ;;  %v2952_v26 = vpop.f32.mrb[73].mxu1  ;;  %v3088_v24 = vld [vmem:[#allocation7 + $0x88] ss:$28 sps:$4 sm:$0xff]  }
 0xc3a   :  { %v2244_v27 = vpop.f32.mrb[74].mxu1  ;;  %v2631_v26 = vld [vmem:[%s3844_s3 + $0x5] ss:$0 sm:$0xff] }
 0xc3b   :  { %3070 = vrot.lane.b32.xlu0 %v3069_v25, %s3275_s10  ;;  %v2953_v28 = vpop.f32.mrb[75].mxu1  ;;  %v3089_v25 = vld [vmem:[#allocation7 + $0xc0] ss:$28 sps:$4 sm:$0xff]   ;;  %s3232_s10 = scalar_lea.vmem %s2563_s9, 256 }
 0xc3c   :  { %p3233_p10 = scmp.ne.s32.totalorder %s2563_s9, %s3232_s10  ;;  %p3238_p12 = scmp.lt.s32.totalorder %s3232_s10, %s3232_s10 }
 0xc3e   :  { %p3239_p13 = por %p3238_p12, %p3237_p11 }
 0xc40   :  { %p3240_p0 = pnand %p3239_p13, %p3233_p10 }
 0xc6f   :  { %v3061_v30 = vpop.permute.xlu0 %3060 }
 0xc70   :  { %v3063_v33 = vunpack.i.h.bf16 %v3061_v30  ;;  %v3062_v31 = vunpack.i.l.bf16 %v3061_v30 }
 0xc72   :  { %v2272_v37 = vsel %vm208_vm2, %v1947_v52, %v3063_v33  ;;  %v2271_v56 = vsel %vm208_vm2, %v1898_v58, %v3062_v31 }
 0xca5   :  { %v3066_v22 = vpop.permute.xlu1 %3065 }
 0xca6   :  { %v3068_v32 = vunpack.i.h.bf16 %v3066_v22  ;;  %v3067_v35 = vunpack.i.l.bf16 %v3066_v22 }
 0xca8   :  { %v2274_v38 = vsel %vm1105_vm5, %v2272_v37, %v3068_v32  ;;  %v2273_v39 = vsel %vm1105_vm5, %v2271_v56, %v3067_v35 }
 0xcad   :  { %v3071_v36 = vpop.permute.xlu0 %3070 }
 0xcae   :  { %v3073_v1 = vunpack.i.h.bf16 %v3071_v36  ;;  %v3072_v55 = vunpack.i.l.bf16 %v3071_v36 }
 0xcb0   :  { %v2276_v40 = vsel %vm1108_vm6, %v2274_v38, %v3073_v1  ;;  %v2275_v41 = vsel %vm1108_vm6, %v2273_v39, %v3072_v55 }
 0xcb1   :  { %v2277_v42 = vpack.c.bf16 %v2276_v40, %v2275_v41 }
 0xcb3   :  { %2959 = vmatmul.mubr.msk.bf16.vlgmr.msra.gmra.mrb[68].mxu0 %vm132_vm1, %v2277_v42 }
 0xcb4   :  { %2978 = vmatprep.mubr.msk.bf16.mxu0 %vm3268_vm0, %v3267_v0  ;;  %2971 = vmatpush3.bf16.msra.mxu0 %v3086_v63 }
 0xcb5   :  { %2972 = vmatprep.subr.bf16.mxu0 %v3267_v0 }
 0xcb8   :  { %2973 = vmatpush3.bf16.msra.mxu0 %v3087_v2 }
 0xcb9   :  { %2974 = vmatprep.subr.bf16.mxu0 %v3267_v0 }
 0xcbc   :  { %2975 = vmatpush3.bf16.msra.mxu0 %v3088_v24 }
 0xcbd   :  { %2976 = vmatprep.subr.bf16.mxu0 %v3267_v0  ;;  %v2635_v0 = vld [vmem:[%s3844_s3 + $0x6] ss:$0 sm:$0xff] }
 0xcc0   :  { %2977 = vmatpush3.bf16.msra.mxu0 %v3089_v25 }
 0xd86   :  { %v2331_v46 = vpop.f32.mrb[68].mxu0 }
 0xd87   :  { %v2332_v47 = vadd.f32 %v2625_v45, %v2331_v46  ;;  %v2960_v48 = vpop.f32.mrb[69].mxu0 }
 0xd88   :  { %v2334_v49 = vpop.f32.mrb[70].mxu0 }
 0xd89   :  { %v2335_v50 = vadd.f32 %v2625_v45, %v2334_v49  ;;  %v2961_v51 = vpop.f32.mrb[71].mxu0  ;;  %v2338_v34 = vadd.f32 %v2332_v47, %v3585_v43 }
 0xd8b   :  { %v2340_v52 = vsel %vm132_vm1, %v2338_v34, 0.0  ;;  %v2339_v53 = vadd.f32 %v2335_v50, %v3587_v44  ;;  %v3085_v44 = vld [vmem:[#allocation7 + $0x4c] ss:$28 sps:$4 sm:$0xff]  }
 0xd8c   :  { %2341 = vadd.xlane.f32.xlu1 %v2340_v52  ;;  %2965 = vmatpush3.bf16.msra.mxu1 %v3085_v44 }
 0xd8d   :  { %v2343_v54 = vsel %vm132_vm1, %v2339_v53, 0.0 }
 0xd8e   :  { %2344 = vadd.xlane.f32.xlu0 %v2343_v54 }
 0xe19   :  { %v2342_v57 = vpop.xlane.xlu1 %2341 }
 0xe1a   :  { %v2346_v58 = vmul.f32 0.03125, %v2342_v57 }
 0xe1b   :  { %v2345_v20 = vpop.xlane.xlu0 %2344 }
 0xe1c   :  { %v2348_v21 = vsub.f32 %v2338_v34, %v2346_v58  ;;  %v2347_v59 = vmul.f32 0.03125, %v2345_v20 }
 0xe1e   :  { %v2349_v60 = vsub.f32 %v2339_v53, %v2347_v59  ;;  %v2350_v61 = vmul.f32 %v2348_v21, %v2348_v21 }
 0xe20   :  { %v2352_v14 = vsel %vm132_vm1, %v2350_v61, 0.0  ;;  %v2351_v15 = vmul.f32 %v2349_v60, %v2349_v60 }
 0xe21   :  { %2353 = vadd.xlane.f32.xlu0 %v2352_v14  ;;  %v2641_v14 = vld [vmem:[%s3844_s3 + $0xc] ss:$0 sm:$0xff] }
 0xe22   :  { %v2355_v43 = vsel %vm132_vm1, %v2351_v15, 0.0 }
 0xe23   :  { %2356 = vadd.xlane.f32.xlu1 %v2355_v43 }
 0xeae   :  { %v2354_v5 = vpop.xlane.xlu0 %2353 }
 0xeaf   :  { %v2358_v6 = vmul.f32 0.03125, %v2354_v5 }
 0xeb0   :  { %v2357_v29 = vpop.xlane.xlu1 %2356 }
 0xeb1   :  { %v2360_v7 = vadd.f32 1e-05, %v2358_v6  ;;  %v2359_v8 = vmul.f32 0.03125, %v2357_v29 }
 0xeb3   :  { %3158 = vrsqrt.f32 %v2360_v7  ;;  %v2361_v9 = vadd.f32 1e-05, %v2359_v8 }
 0xeb5   :  { %3160 = vrsqrt.f32 %v2361_v9 }
 0xebd   :  { %v3159_v10 = vpop.eup %3158 }
 0xebe   :  { %v2364_v12 = vmul.f32 %v3159_v10, %v2348_v21 }
 0xebf   :  { %v3161_v13 = vpop.eup %3160 }
 0xec0   :  { %v2370_v16 = vmul.f32 %v2629_v11, %v2364_v12  ;;  %v2365_v17 = vmul.f32 %v3161_v13, %v2349_v60 }
 0xec2   :  { %v2371_v3 = vmul.f32 %v2629_v11, %v2365_v17  ;;  %v2376_v19 = vadd.f32 %v2630_v18, %v2370_v16 }
 0xec4   :  { %v2377_v4 = vadd.f32 %v2630_v18, %v2371_v3 }
 0xec6   :  { %v2378_v23 = vpack.c.bf16 %v2377_v4, %v2376_v19 }
 0xec8   :  { %2967 = vmatmul.mubr.msk.bf16.vlgmr.msra.gmra.mrb[76].mxu1 %vm132_vm1, %v2378_v23 }
 0xf9b   :  { %v2432_v27 = vpop.f32.mrb[76].mxu1 }
 0xf9c   :  { %v2433_v28 = vadd.f32 %v2631_v26, %v2432_v27  ;;  %v2968_v30 = vpop.f32.mrb[77].mxu1 }
 0xf9d   :  { %v2435_v22 = vpop.f32.mrb[78].mxu1 }
 0xf9e   :  { %v2436_v33 = vadd.f32 %v2631_v26, %v2435_v22  ;;  %v2969_v31 = vpop.f32.mrb[79].mxu1  ;;  %v2439_v32 = vmax.f32 %v2433_v28, 0.0 }
 0xfa0   :  { %v2440_v35 = vmax.f32 %v2436_v33, 0.0 }
 0xfa2   :  { %v2441_v36 = vpack.c.bf16 %v2440_v35, %v2439_v32 }
 0xfa4   :  { %2979 = vmatmul.mubr.msk.bf16.vlgmr.msra.gmra.mrb[72].mxu0 %vm2470_vm7, %v2441_v36 }
0x1077   :  { %v2508_v37 = vpop.f32.mrb[72].mxu0 }
0x1078   :  { %v2509_v56 = vadd.f32 %v2635_v0, %v2508_v37  ;;  %v2980_v1 = vpop.f32.mrb[73].mxu0 }
0x1079   :  { %v2511_v55 = vpop.f32.mrb[74].mxu0 }
0x107a   :  { %v2512_v38 = vadd.f32 %v2635_v0, %v2511_v55  ;;  %v2981_v39 = vpop.f32.mrb[75].mxu0  ;;  %v2515_v40 = vadd.f32 %v2509_v56, %v2376_v19 }
0x107c   :  { %v2517_v41 = vsel %vm132_vm1, %v2515_v40, 0.0  ;;  %v2516_v42 = vadd.f32 %v2512_v38, %v2377_v4 }
0x107d   :  { %2518 = vadd.xlane.f32.xlu0 %v2517_v41 }
0x107e   :  { %v2520_v45 = vsel %vm132_vm1, %v2516_v42, 0.0 }
0x107f   :  { %2521 = vadd.xlane.f32.xlu1 %v2520_v45 }
0x110a   :  { %v2519_v46 = vpop.xlane.xlu0 %2518 }
0x110b   :  { %v2523_v47 = vmul.f32 0.03125, %v2519_v46 }
0x110c   :  { %v2522_v48 = vpop.xlane.xlu1 %2521 }
0x110d   :  { %v2525_v49 = vsub.f32 %v2515_v40, %v2523_v47  ;;  %v2524_v50 = vmul.f32 0.03125, %v2522_v48 }
0x110f   :  { %v2526_v51 = vsub.f32 %v2516_v42, %v2524_v50  ;;  %v2527_v34 = vmul.f32 %v2525_v49, %v2525_v49 }
0x1111   :  { %v2529_v52 = vsel %vm132_vm1, %v2527_v34, 0.0  ;;  %v2528_v53 = vmul.f32 %v2526_v51, %v2526_v51 }
0x1112   :  { %2530 = vadd.xlane.f32.xlu0 %v2529_v52 }
0x1113   :  { %v2532_v54 = vsel %vm132_vm1, %v2528_v53, 0.0 }
0x1114   :  { %2533 = vadd.xlane.f32.xlu1 %v2532_v54 }
0x119f   :  { %v2531_v57 = vpop.xlane.xlu0 %2530 }
0x11a0   :  { %v2535_v58 = vmul.f32 0.03125, %v2531_v57 }
0x11a1   :  { %v2534_v20 = vpop.xlane.xlu1 %2533 }
0x11a2   :  { %v2537_v21 = vadd.f32 1e-05, %v2535_v58  ;;  %v2536_v59 = vmul.f32 0.03125, %v2534_v20 }
0x11a4   :  { %3162 = vrsqrt.f32 %v2537_v21  ;;  %v2538_v60 = vadd.f32 1e-05, %v2536_v59 }
0x11a6   :  { %3164 = vrsqrt.f32 %v2538_v60 }
0x11ae   :  { %v3163_v61 = vpop.eup %3162 }
0x11af   :  { %v2541_v15 = vmul.f32 %v3163_v61, %v2525_v49 }
0x11b0   :  { %v3165_v43 = vpop.eup %3164 }
0x11b1   :  { %v2542_v44 = vmul.f32 %v3165_v43, %v2526_v51  ;;  %v2547_v63 = vmul.f32 %v2641_v14, %v2541_v15 }
0x11b3   :  { %v2548_v2 = vmul.f32 %v2641_v14, %v2542_v44  ;;  %v2553_v5 = vadd.f32 %v2642_v62, %v2547_v63 }
0x11b5   :  { %v2554_v6 = vadd.f32 %v2642_v62, %v2548_v2  ;;  %2555 = vst.msk [vmem:[#allocation8] sm:$0xff] %vm132_vm1, %v2553_v5 }
0x11b7   :  { %2556 = vst.msk [vmem:[#allocation8 + $0x8] sm:$0xff] %vm132_vm1, %v2554_v6 }
0x11b8   :  { %3243 = shalt.err (!%p3240_p0)
}
0x11b9   :  { %s3244_s12 = scalar_lea.hbm %s3845_s4, 256 }
0x11ba   :  { %p3245_p1 = scmp.ne.s32.totalorder %s3845_s4, %s3244_s12  ;;  %p3248_p2 = scmp.lt.u32.totalorder %s3244_s12, %s3845_s4 }
0x11bc   :  { %p3250_p3 = pnand %p3248_p2, %p3245_p1 }
0x11be   :  { %3253 = shalt.err (!%p3250_p3)
}
0x11bf   :  { %2568 = dma.vmem_to_hbm [thread:$0]  %s2563_s9, 256, %s3845_s4, [#allocation4], %s3262_s27, %s3262_s27, %s3263_s28  }
0x11c0   :  { %3258 = dma.done.wait [#allocation4], 256  }
0x11c1   :  { %3259 = vsyncadd [#allocation4], 4294967040 }
0x11c2   :  { %2572 = vsyncpa [#allocation3], 1 }
0x11c3   :  { %2573 = vsyncpa [#allocation6], 1 }
0x11c4   :  { %2574 = vsyncpa [#allocation4], 1 }

</bundles_post_ra>
